<compile_context>
chip_gen: v5e
topology: v5e:2x2
jax: 0.10.0
libtpu: 0.0.40
codegen_flags: <defaults>
</compile_context>

<pallas_src>
import functools

import jax
import jax.numpy as jnp
from jax.experimental import pallas as pl
from jax.experimental.pallas import tpu as pltpu


_H = 15          # spatial size implied by flatten_size = 8 * 15 * 15
_W = 15
_C1 = 8          # conv output channels
_NPAD = 128      # lane-dense head width: [actor logits | critic value | zeros]


def _round_up(n, m):
    return ((n + m - 1) // m) * m


# ----------------------------------------------------------------------------
# One-time parameter preparation (hoisted off the hot path)
# ----------------------------------------------------------------------------
def _toeplitz_conv_weight(w_oihw, width=_W):
    """PyTorch (Cout, Cin, 3, 3) conv weight -> (3, W*Cin, W*Cout).

    Tap d (= kh) maps an (un-width-padded) input row with lanes in
    width-major / channel-minor order to an output row in the same layout.
    T_d[w_in*Cin + c_in, w_out*Cout + c_out] = w[c_out, c_in, d, w_in-w_out+1]
    when the width tap is in range, else 0 (this realises the SAME zero
    padding along width without materialising padded columns).
    """
    c_out, c_in, kh, kw_sz = w_oihw.shape
    w_in = jnp.arange(width)[:, None]
    w_out = jnp.arange(width)[None, :]
    kw = w_in - w_out + 1
    valid = (kw >= 0) & (kw < kw_sz)
    kw_c = jnp.clip(kw, 0, kw_sz - 1)
    mats = []
    for d in range(kh):
        wt = jnp.transpose(w_oihw[:, :, d, :], (2, 1, 0))        # (kw, Cin, Cout)
        t = jnp.where(valid[:, :, None, None], wt[kw_c], 0.0)    # (W, W, Cin, Cout)
        mats.append(jnp.transpose(t, (0, 2, 1, 3)).reshape(width * c_in,
                                                           width * c_out))
    return jnp.stack(mats, axis=0)


def _conv_bias_cols(b, width=_W):
    """Conv bias -> (1, W*Cout) row in width-major / channel-minor lane order."""
    c = b.shape[0]
    return jnp.tile(b.astype(jnp.float32), width).reshape(1, width * c)


def _fc_head_weight(fc_w, h=_H, w=_W, c=_C1, n_pad=_NPAD):
    """(N, c*h*w) PyTorch-flatten FC weight -> (h, w*c, n_pad).

    Folds the NCHW flatten permutation into the weight so the kernel consumes
    conv2 output rows (width-major / channel-minor lanes) directly.
    """
    n = fc_w.shape[0]
    wt = fc_w.reshape(n, c, h, w)
    wt = jnp.transpose(wt, (2, 3, 1, 0))                          # (h, w, c, n)
    wt = jnp.pad(wt, ((0, 0), (0, 0), (0, 0), (0, n_pad - n)))
    return wt.reshape(h, w * c, n_pad)


def prepare_params(params, compute_dtype=jnp.bfloat16):
    """Preprocess PyTorch-layout parameters once (bf16 MXU operands)."""
    num_actions = params["fc_actor_w"].shape[0]
    if num_actions + 1 > _NPAD:
        raise ValueError(f"num_actions + 1 must be <= {_NPAD}, got {num_actions + 1}")
    fc_w = jnp.concatenate([params["fc_actor_w"], params["fc_critic_w"]], axis=0)
    fc_b = jnp.concatenate([params["fc_actor_b"], params["fc_critic_b"]], axis=0)
    bf = jnp.zeros((1, _NPAD), jnp.float32).at[0, :num_actions + 1].set(
        fc_b.astype(jnp.float32))
    return {
        "w1": _toeplitz_conv_weight(params["conv1_w"]).astype(compute_dtype),
        "b1": _conv_bias_cols(params["conv1_b"]),
        "w2": _toeplitz_conv_weight(params["conv2_w"]).astype(compute_dtype),
        "b2": _conv_bias_cols(params["conv2_b"]),
        "wf": _fc_head_weight(fc_w).astype(compute_dtype),
        "bf": bf,
    }


# ----------------------------------------------------------------------------
# Fused Pallas kernel: conv1+ReLU -> conv2+ReLU -> merged actor/critic heads
# ----------------------------------------------------------------------------
def _fused_forward_kernel(x_ref, w1_ref, b1_ref, w2_ref, b2_ref, wf_ref, bf_ref,
                          o_ref, z1_ref):
    # x_ref : (Hp, tb, W*Cin)   height-padded input rows, batch on sublanes
    # z1_ref: (Hp*tb, W*8)      conv1 activation slab (height-padded), VMEM
    # o_ref : (tb, 128)         [actor logits | critic value | zero pad]
    hp, tb, l_in = x_ref.shape
    h_out = hp - 2                       # 15
    l_mid = z1_ref.shape[1]              # 120
    n_out = o_ref.shape[1]               # 128
    m = h_out * tb                       # batched-tap matmul M dimension
    cdt = z1_ref.dtype
    f32 = jnp.float32

    # View the x block as a (Hp*tb, L_in) slab: leading height axis folded
    # into sublanes, so each tap is a contiguous row slice.
    x = x_ref[...].reshape(hp * tb, l_in)

    # conv1 + bias + ReLU: 3 batched tap matmuls, one fused epilogue.
    acc = jnp.dot(x[0:m], w1_ref[0], preferred_element_type=f32)
    acc += jnp.dot(x[tb:tb + m], w1_ref[1], preferred_element_type=f32)
    acc += jnp.dot(x[2 * tb:2 * tb + m], w1_ref[2], preferred_element_type=f32)
    y1 = jnp.maximum(acc + b1_ref[...].astype(f32), 0.0).astype(cdt)

    # Stash conv1 output into the height-padded scratch (rows 0 / Hp-1 = zero).
    zero_blk = jnp.zeros((tb, l_mid), cdt)
    z1_ref[pl.ds(0, tb)] = zero_blk
    z1_ref[pl.ds((hp - 1) * tb, tb)] = zero_blk
    z1_ref[pl.ds(tb, m)] = y1

    # conv2 + bias + ReLU: same batched-tap structure on the scratch slab.
    acc2 = jnp.dot(z1_ref[pl.ds(0, m)], w2_ref[0], preferred_element_type=f32)
    acc2 += jnp.dot(z1_ref[pl.ds(tb, m)], w2_ref[1], preferred_element_type=f32)
    acc2 += jnp.dot(z1_ref[pl.ds(2 * tb, m)], w2_ref[2], preferred_element_type=f32)
    y2 = jnp.maximum(acc2 + b2_ref[...].astype(f32), 0.0).astype(cdt)

    # Merged actor/critic head: out[b, :] = sum_h y2[h, b, :] @ wf[h].
    out = jnp.dot(y2[0:tb], wf_ref[0], preferred_element_type=f32)
    for h in range(1, h_out):
        out += jnp.dot(y2[h * tb:(h + 1) * tb], wf_ref[h],
                       preferred_element_type=f32)
    o_ref[...] = (out + bf_ref[...].astype(f32)).astype(o_ref.dtype)


# ----------------------------------------------------------------------------
# Batch-tile selection
# ----------------------------------------------------------------------------
def _pick_batch_tile(b, tb_max=256, target_blocks=2):
    """Tile multiple of 8, <= tb_max, minimal padding waste; when there is
    enough work, use >= target_blocks grid blocks so the parallel grid axis
    can shard across both TensorCores on multi-TC chips (v7x)."""
    bp8 = _round_up(max(b, 1), 8)
    min_blocks = -(-bp8 // tb_max)                       # keep tb <= tb_max
    want_blocks = target_blocks if bp8 >= target_blocks * 32 else 1
    n_blocks = max(min_blocks, want_blocks)
    tb = _round_up(-(-bp8 // n_blocks), 8)
    return tb, tb * n_blocks


# ----------------------------------------------------------------------------
# Forward (jittable): input layout + single pallas_call + head split
# ----------------------------------------------------------------------------
def cnn_actor_critic_forward(x_nchw, prepped, *, num_actions, block_b=None):
    b, c_in, h, w = x_nchw.shape
    assert (h, w) == (_H, _W), "flatten_size = 8*15*15 implies 15x15 inputs"
    assert num_actions + 1 <= _NPAD, "merged head supports at most 127 actions"
    cdt = prepped["w1"].dtype

    if block_b is not None:
        tb = _round_up(block_b, 8)
        bp = _round_up(b, tb)
    else:
        tb, bp = _pick_batch_tile(b)
    n_blocks = bp // tb
    hp = h + 2
    l_in = w * c_in              # input lanes: width-major, channel-minor
    l_mid = _W * _C1             # 120 activation lanes (single 128-lane tile)

    # (B, Cin, H, W) -> (H+2, Bp, W*Cin): height padding + batch padding only.
    # TODO(synk): accept a pre-laid-out (H, B, W*C) activation from the caller
    # to drop this transpose/pad pass (an extra HBM round trip) entirely.
    xp = jnp.transpose(x_nchw, (2, 0, 3, 1)).astype(cdt).reshape(h, b, l_in)
    xp = jnp.pad(xp, ((1, 1), (0, bp - b), (0, 0)))

    out = pl.pallas_call(
        _fused_forward_kernel,
        out_shape=jax.ShapeDtypeStruct((bp, _NPAD), jnp.float32),
        grid=(n_blocks,),
        in_specs=[
            pl.BlockSpec((hp, tb, l_in), lambda i: (0, i, 0)),
            pl.BlockSpec((3, l_in, l_mid), lambda i: (0, 0, 0)),
            pl.BlockSpec((1, l_mid), lambda i: (0, 0)),
            pl.BlockSpec((3, l_mid, l_mid), lambda i: (0, 0, 0)),
            pl.BlockSpec((1, l_mid), lambda i: (0, 0)),
            pl.BlockSpec((_H, l_mid, _NPAD), lambda i: (0, 0, 0)),
            pl.BlockSpec((1, _NPAD), lambda i: (0, 0)),
        ],
        out_specs=pl.BlockSpec((tb, _NPAD), lambda i: (i, 0)),
        scratch_shapes=[pltpu.VMEM((hp * tb, l_mid), cdt)],
        compiler_params=pltpu.CompilerParams(
            dimension_semantics=("parallel",),
            vmem_limit_bytes=32 * 1024 * 1024),
    )(xp, prepped["w1"], prepped["b1"], prepped["w2"], prepped["b2"],
      prepped["wf"], prepped["bf"])

    out = out[:b]
    action_logits = out[:, :num_actions]
    state_values = out[:, num_actions:num_actions + 1]
    return action_logits, state_values


# TODO(synk): act()/evaluate() (Categorical sampling, log_prob, entropy) are
# thin host-side ops on the returned logits and are intentionally not kernelized.


# ----------------------------------------------------------------------------
# Deterministic parameter init (PyTorch-default-style uniform bounds)
# ----------------------------------------------------------------------------
def init_params(key, input_channels, num_actions):
    flatten_size = _C1 * _H * _W
    ks = jax.random.split(key, 8)

    def u(k, shape, fan_in):
        bound = 1.0 / jnp.sqrt(jnp.float32(fan_in))
        return jax.random.uniform(k, shape, jnp.float32, -bound, bound)

    return {
        "conv1_w": u(ks[0], (_C1, input_channels, 3, 3), input_channels * 9),
        "conv1_b": u(ks[1], (_C1,), input_channels * 9),
        "conv2_w": u(ks[2], (_C1, _C1, 3, 3), _C1 * 9),
        "conv2_b": u(ks[3], (_C1,), _C1 * 9),
        "fc_actor_w": u(ks[4], (num_actions, flatten_size), flatten_size),
        "fc_actor_b": u(ks[5], (num_actions,), flatten_size),
        "fc_critic_w": u(ks[6], (1, flatten_size), flatten_size),
        "fc_critic_b": u(ks[7], (1,), flatten_size),
    }


# ----------------------------------------------------------------------------
# Pure-JAX reference (correctness check only)
# ----------------------------------------------------------------------------
def _reference_forward(x_nchw, params):
    def conv(x, w, b):
        y = jax.lax.conv_general_dilated(
            x, w, window_strides=(1, 1), padding="SAME",
            dimension_numbers=("NCHW", "OIHW", "NCHW"))
        return jax.nn.relu(y + b[None, :, None, None])

    h = conv(x_nchw.astype(jnp.float32), params["conv1_w"], params["conv1_b"])
    h = conv(h, params["conv2_w"], params["conv2_b"])
    flat = h.reshape(h.shape[0], -1)
    logits = flat @ params["fc_actor_w"].T + params["fc_actor_b"]
    values = flat @ params["fc_critic_w"].T + params["fc_critic_b"]
    return logits, values


if __name__ == "__main__":
    B, C_in, H, W = 2, 4, 15, 15   # flatten_size = 8*15*15 implies 15x15 input
    num_actions = 5

    key = jax.random.PRNGKey(0)
    k_params, k_x = jax.random.split(key)
    params = init_params(k_params, C_in, num_actions)
    x = jax.random.normal(k_x, (B, C_in, H, W), jnp.float32)

    # One-time weight preprocessing (hoisted out of the hot path).
    prepped = prepare_params(params)

    fwd = jax.jit(functools.partial(cnn_actor_critic_forward,
                                    num_actions=num_actions))
    logits, values = fwd(x, prepped)
    jax.block_until_ready((logits, values))

    assert logits.shape == (B, num_actions) and values.shape == (B, 1)

    ref_logits, ref_values = _reference_forward(x, params)
    # bf16 MXU operands with f32 accumulation -> compare with a bf16 tolerance.
    assert jnp.allclose(logits, ref_logits, atol=2e-2, rtol=2e-2), (
        float(jnp.max(jnp.abs(logits - ref_logits))))
    assert jnp.allclose(values, ref_values, atol=2e-2, rtol=2e-2), (
        float(jnp.max(jnp.abs(values - ref_values))))

    print("KERNEL_OK")
</pallas_src>

<mosaic_0001>
module attributes {stable_mosaic.version = 11 : i64} {
  func.func @_fused_forward_kernel(%arg0: i32, %arg1: memref<17x8x60xbf16, #tpu.memory_space<vmem>>, %arg2: memref<3x60x120xbf16, #tpu.memory_space<vmem>>, %arg3: memref<1x120xf32, #tpu.memory_space<vmem>>, %arg4: memref<3x120x120xbf16, #tpu.memory_space<vmem>>, %arg5: memref<1x120xf32, #tpu.memory_space<vmem>>, %arg6: memref<15x120x128xbf16, #tpu.memory_space<vmem>>, %arg7: memref<1x128xf32, #tpu.memory_space<vmem>>, %arg8: memref<8x128xf32, #tpu.memory_space<vmem>>, %arg9: memref<136x120xbf16, #tpu.memory_space<vmem>>) attributes {dimension_semantics = [#tpu.dimension_semantics<parallel>], iteration_bounds = array<i64: 1>, scalar_prefetch = 0 : i64, scratch_operands = 1 : i64, tpu.core_type = #tpu.core_type<tc>, window_params = [{transform_indices = @transform_0, window_bounds = array<i64: 17, 8, 60>}, {pipeline_mode = #tpu.pipeline_mode<synchronous>, transform_indices = @transform_1, window_bounds = array<i64: 3, 60, 120>}, {pipeline_mode = #tpu.pipeline_mode<synchronous>, transform_indices = @transform_2, window_bounds = array<i64: 1, 120>}, {pipeline_mode = #tpu.pipeline_mode<synchronous>, transform_indices = @transform_3, window_bounds = array<i64: 3, 120, 120>}, {pipeline_mode = #tpu.pipeline_mode<synchronous>, transform_indices = @transform_4, window_bounds = array<i64: 1, 120>}, {pipeline_mode = #tpu.pipeline_mode<synchronous>, transform_indices = @transform_5, window_bounds = array<i64: 15, 120, 128>}, {pipeline_mode = #tpu.pipeline_mode<synchronous>, transform_indices = @transform_6, window_bounds = array<i64: 1, 128>}, {transform_indices = @transform_7, window_bounds = array<i64: 8, 128>}]} {
    %c0 = arith.constant 0 : index
    %c0_0 = arith.constant 0 : index
    %c0_1 = arith.constant 0 : index
    %0 = vector.load %arg1[%c0, %c0_0, %c0_1] : memref<17x8x60xbf16, #tpu.memory_space<vmem>>, vector<17x8x60xbf16>
    %1 = vector.shape_cast %0 : vector<17x8x60xbf16> to vector<136x60xbf16>
    %2 = vector.extract_strided_slice %1 {offsets = [0, 0], sizes = [120, 60], strides = [1, 1]} : vector<136x60xbf16> to vector<120x60xbf16>
    %c0_2 = arith.constant 0 : index
    %c0_3 = arith.constant 0 : index
    %c0_4 = arith.constant 0 : index
    %3 = vector.load %arg2[%c0_2, %c0_3, %c0_4] : memref<3x60x120xbf16, #tpu.memory_space<vmem>>, vector<1x60x120xbf16>
    %4 = vector.shape_cast %3 : vector<1x60x120xbf16> to vector<60x120xbf16>
    %cst = arith.constant dense<0.000000e+00> : vector<120x120xf32>
    %5 = tpu.matmul %2, %4, %cst {dimension_numbers = #tpu.dot_dimension_numbers<[1], [0], [0], [1], [0, 0, 1, 1], [], []>} : vector<120x60xbf16>, vector<60x120xbf16>, vector<120x120xf32> -> vector<120x120xf32>
    %6 = vector.extract_strided_slice %1 {offsets = [8, 0], sizes = [120, 60], strides = [1, 1]} : vector<136x60xbf16> to vector<120x60xbf16>
    %c1 = arith.constant 1 : index
    %c0_5 = arith.constant 0 : index
    %c0_6 = arith.constant 0 : index
    %7 = vector.load %arg2[%c1, %c0_5, %c0_6] : memref<3x60x120xbf16, #tpu.memory_space<vmem>>, vector<1x60x120xbf16>
    %8 = vector.shape_cast %7 : vector<1x60x120xbf16> to vector<60x120xbf16>
    %cst_7 = arith.constant dense<0.000000e+00> : vector<120x120xf32>
    %9 = tpu.matmul %6, %8, %cst_7 {dimension_numbers = #tpu.dot_dimension_numbers<[1], [0], [0], [1], [0, 0, 1, 1], [], []>} : vector<120x60xbf16>, vector<60x120xbf16>, vector<120x120xf32> -> vector<120x120xf32>
    %10 = arith.addf %5, %9 : vector<120x120xf32>
    %11 = vector.extract_strided_slice %1 {offsets = [16, 0], sizes = [120, 60], strides = [1, 1]} : vector<136x60xbf16> to vector<120x60xbf16>
    %c2 = arith.constant 2 : index
    %c0_8 = arith.constant 0 : index
    %c0_9 = arith.constant 0 : index
    %12 = vector.load %arg2[%c2, %c0_8, %c0_9] : memref<3x60x120xbf16, #tpu.memory_space<vmem>>, vector<1x60x120xbf16>
    %13 = vector.shape_cast %12 : vector<1x60x120xbf16> to vector<60x120xbf16>
    %cst_10 = arith.constant dense<0.000000e+00> : vector<120x120xf32>
    %14 = tpu.matmul %11, %13, %cst_10 {dimension_numbers = #tpu.dot_dimension_numbers<[1], [0], [0], [1], [0, 0, 1, 1], [], []>} : vector<120x60xbf16>, vector<60x120xbf16>, vector<120x120xf32> -> vector<120x120xf32>
    %15 = arith.addf %10, %14 : vector<120x120xf32>
    %c0_11 = arith.constant 0 : index
    %c0_12 = arith.constant 0 : index
    %16 = vector.load %arg3[%c0_11, %c0_12] : memref<1x120xf32, #tpu.memory_space<vmem>>, vector<1x120xf32>
    %17 = vector.broadcast %16 : vector<1x120xf32> to vector<120x120xf32>
    %18 = arith.addf %15, %17 : vector<120x120xf32>
    %cst_13 = arith.constant 0.000000e+00 : f32
    %19 = vector.broadcast %cst_13 : f32 to vector<120x120xf32>
    %20 = arith.maximumf %18, %19 : vector<120x120xf32>
    %21 = arith.truncf %20 : vector<120x120xf32> to vector<120x120xbf16>
    %cst_14 = arith.constant 0.000000e+00 : bf16
    %22 = vector.broadcast %cst_14 : bf16 to vector<8x120xbf16>
    %c0_15 = arith.constant 0 : index
    %c0_16 = arith.constant 0 : index
    %23 = vector.load %arg9[%c0_15, %c0_16] : memref<136x120xbf16, #tpu.memory_space<vmem>>, vector<8x120xbf16>
    tpu.vector_store %arg9[%c0_15, %c0_16], %22 {strides = array<i32>} : memref<136x120xbf16, #tpu.memory_space<vmem>>, vector<8x120xbf16>,
    %c128 = arith.constant 128 : index
    %c0_17 = arith.constant 0 : index
    %24 = vector.load %arg9[%c128, %c0_17] : memref<136x120xbf16, #tpu.memory_space<vmem>>, vector<8x120xbf16>
    tpu.vector_store %arg9[%c128, %c0_17], %22 {strides = array<i32>} : memref<136x120xbf16, #tpu.memory_space<vmem>>, vector<8x120xbf16>,
    %c8 = arith.constant 8 : index
    %c0_18 = arith.constant 0 : index
    %25 = vector.load %arg9[%c8, %c0_18] : memref<136x120xbf16, #tpu.memory_space<vmem>>, vector<120x120xbf16>
    tpu.vector_store %arg9[%c8, %c0_18], %21 {strides = array<i32>} : memref<136x120xbf16, #tpu.memory_space<vmem>>, vector<120x120xbf16>,
    %c0_19 = arith.constant 0 : index
    %c0_20 = arith.constant 0 : index
    %26 = vector.load %arg9[%c0_19, %c0_20] : memref<136x120xbf16, #tpu.memory_space<vmem>>, vector<120x120xbf16>
    %c0_21 = arith.constant 0 : index
    %c0_22 = arith.constant 0 : index
    %c0_23 = arith.constant 0 : index
    %27 = vector.load %arg4[%c0_21, %c0_22, %c0_23] : memref<3x120x120xbf16, #tpu.memory_space<vmem>>, vector<1x120x120xbf16>
    %28 = vector.shape_cast %27 : vector<1x120x120xbf16> to vector<120x120xbf16>
    %cst_24 = arith.constant dense<0.000000e+00> : vector<120x120xf32>
    %29 = tpu.matmul %26, %28, %cst_24 {dimension_numbers = #tpu.dot_dimension_numbers<[1], [0], [0], [1], [0, 0, 1, 1], [], []>} : vector<120x120xbf16>, vector<120x120xbf16>, vector<120x120xf32> -> vector<120x120xf32>
    %c8_25 = arith.constant 8 : index
    %c0_26 = arith.constant 0 : index
    %30 = vector.load %arg9[%c8_25, %c0_26] : memref<136x120xbf16, #tpu.memory_space<vmem>>, vector<120x120xbf16>
    %c1_27 = arith.constant 1 : index
    %c0_28 = arith.constant 0 : index
    %c0_29 = arith.constant 0 : index
    %31 = vector.load %arg4[%c1_27, %c0_28, %c0_29] : memref<3x120x120xbf16, #tpu.memory_space<vmem>>, vector<1x120x120xbf16>
    %32 = vector.shape_cast %31 : vector<1x120x120xbf16> to vector<120x120xbf16>
    %cst_30 = arith.constant dense<0.000000e+00> : vector<120x120xf32>
    %33 = tpu.matmul %30, %32, %cst_30 {dimension_numbers = #tpu.dot_dimension_numbers<[1], [0], [0], [1], [0, 0, 1, 1], [], []>} : vector<120x120xbf16>, vector<120x120xbf16>, vector<120x120xf32> -> vector<120x120xf32>
    %34 = arith.addf %29, %33 : vector<120x120xf32>
    %c16 = arith.constant 16 : index
    %c0_31 = arith.constant 0 : index
    %35 = vector.load %arg9[%c16, %c0_31] : memref<136x120xbf16, #tpu.memory_space<vmem>>, vector<120x120xbf16>
    %c2_32 = arith.constant 2 : index
    %c0_33 = arith.constant 0 : index
    %c0_34 = arith.constant 0 : index
    %36 = vector.load %arg4[%c2_32, %c0_33, %c0_34] : memref<3x120x120xbf16, #tpu.memory_space<vmem>>, vector<1x120x120xbf16>
    %37 = vector.shape_cast %36 : vector<1x120x120xbf16> to vector<120x120xbf16>
    %cst_35 = arith.constant dense<0.000000e+00> : vector<120x120xf32>
    %38 = tpu.matmul %35, %37, %cst_35 {dimension_numbers = #tpu.dot_dimension_numbers<[1], [0], [0], [1], [0, 0, 1, 1], [], []>} : vector<120x120xbf16>, vector<120x120xbf16>, vector<120x120xf32> -> vector<120x120xf32>
    %39 = arith.addf %34, %38 : vector<120x120xf32>
    %c0_36 = arith.constant 0 : index
    %c0_37 = arith.constant 0 : index
    %40 = vector.load %arg5[%c0_36, %c0_37] : memref<1x120xf32, #tpu.memory_space<vmem>>, vector<1x120xf32>
    %41 = vector.broadcast %40 : vector<1x120xf32> to vector<120x120xf32>
    %42 = arith.addf %39, %41 : vector<120x120xf32>
    %cst_38 = arith.constant 0.000000e+00 : f32
    %43 = vector.broadcast %cst_38 : f32 to vector<120x120xf32>
    %44 = arith.maximumf %42, %43 : vector<120x120xf32>
    %45 = arith.truncf %44 : vector<120x120xf32> to vector<120x120xbf16>
    %46 = vector.extract_strided_slice %45 {offsets = [0, 0], sizes = [8, 120], strides = [1, 1]} : vector<120x120xbf16> to vector<8x120xbf16>
    %c0_39 = arith.constant 0 : index
    %c0_40 = arith.constant 0 : index
    %c0_41 = arith.constant 0 : index
    %47 = vector.load %arg6[%c0_39, %c0_40, %c0_41] : memref<15x120x128xbf16, #tpu.memory_space<vmem>>, vector<1x120x128xbf16>
    %48 = vector.shape_cast %47 : vector<1x120x128xbf16> to vector<120x128xbf16>
    %cst_42 = arith.constant dense<0.000000e+00> : vector<8x128xf32>
    %49 = tpu.matmul %46, %48, %cst_42 {dimension_numbers = #tpu.dot_dimension_numbers<[1], [0], [0], [1], [0, 0, 1, 1], [], []>} : vector<8x120xbf16>, vector<120x128xbf16>, vector<8x128xf32> -> vector<8x128xf32>
    %50 = vector.extract_strided_slice %45 {offsets = [8, 0], sizes = [8, 120], strides = [1, 1]} : vector<120x120xbf16> to vector<8x120xbf16>
    %c1_43 = arith.constant 1 : index
    %c0_44 = arith.constant 0 : index
    %c0_45 = arith.constant 0 : index
    %51 = vector.load %arg6[%c1_43, %c0_44, %c0_45] : memref<15x120x128xbf16, #tpu.memory_space<vmem>>, vector<1x120x128xbf16>
    %52 = vector.shape_cast %51 : vector<1x120x128xbf16> to vector<120x128xbf16>
    %cst_46 = arith.constant dense<0.000000e+00> : vector<8x128xf32>
    %53 = tpu.matmul %50, %52, %cst_46 {dimension_numbers = #tpu.dot_dimension_numbers<[1], [0], [0], [1], [0, 0, 1, 1], [], []>} : vector<8x120xbf16>, vector<120x128xbf16>, vector<8x128xf32> -> vector<8x128xf32>
    %54 = arith.addf %49, %53 : vector<8x128xf32>
    %55 = vector.extract_strided_slice %45 {offsets = [16, 0], sizes = [8, 120], strides = [1, 1]} : vector<120x120xbf16> to vector<8x120xbf16>
    %c2_47 = arith.constant 2 : index
    %c0_48 = arith.constant 0 : index
    %c0_49 = arith.constant 0 : index
    %56 = vector.load %arg6[%c2_47, %c0_48, %c0_49] : memref<15x120x128xbf16, #tpu.memory_space<vmem>>, vector<1x120x128xbf16>
    %57 = vector.shape_cast %56 : vector<1x120x128xbf16> to vector<120x128xbf16>
    %cst_50 = arith.constant dense<0.000000e+00> : vector<8x128xf32>
    %58 = tpu.matmul %55, %57, %cst_50 {dimension_numbers = #tpu.dot_dimension_numbers<[1], [0], [0], [1], [0, 0, 1, 1], [], []>} : vector<8x120xbf16>, vector<120x128xbf16>, vector<8x128xf32> -> vector<8x128xf32>
    %59 = arith.addf %54, %58 : vector<8x128xf32>
    %60 = vector.extract_strided_slice %45 {offsets = [24, 0], sizes = [8, 120], strides = [1, 1]} : vector<120x120xbf16> to vector<8x120xbf16>
    %c3 = arith.constant 3 : index
    %c0_51 = arith.constant 0 : index
    %c0_52 = arith.constant 0 : index
    %61 = vector.load %arg6[%c3, %c0_51, %c0_52] : memref<15x120x128xbf16, #tpu.memory_space<vmem>>, vector<1x120x128xbf16>
    %62 = vector.shape_cast %61 : vector<1x120x128xbf16> to vector<120x128xbf16>
    %cst_53 = arith.constant dense<0.000000e+00> : vector<8x128xf32>
    %63 = tpu.matmul %60, %62, %cst_53 {dimension_numbers = #tpu.dot_dimension_numbers<[1], [0], [0], [1], [0, 0, 1, 1], [], []>} : vector<8x120xbf16>, vector<120x128xbf16>, vector<8x128xf32> -> vector<8x128xf32>
    %64 = arith.addf %59, %63 : vector<8x128xf32>
    %65 = vector.extract_strided_slice %45 {offsets = [32, 0], sizes = [8, 120], strides = [1, 1]} : vector<120x120xbf16> to vector<8x120xbf16>
    %c4 = arith.constant 4 : index
    %c0_54 = arith.constant 0 : index
    %c0_55 = arith.constant 0 : index
    %66 = vector.load %arg6[%c4, %c0_54, %c0_55] : memref<15x120x128xbf16, #tpu.memory_space<vmem>>, vector<1x120x128xbf16>
    %67 = vector.shape_cast %66 : vector<1x120x128xbf16> to vector<120x128xbf16>
    %cst_56 = arith.constant dense<0.000000e+00> : vector<8x128xf32>
    %68 = tpu.matmul %65, %67, %cst_56 {dimension_numbers = #tpu.dot_dimension_numbers<[1], [0], [0], [1], [0, 0, 1, 1], [], []>} : vector<8x120xbf16>, vector<120x128xbf16>, vector<8x128xf32> -> vector<8x128xf32>
    %69 = arith.addf %64, %68 : vector<8x128xf32>
    %70 = vector.extract_strided_slice %45 {offsets = [40, 0], sizes = [8, 120], strides = [1, 1]} : vector<120x120xbf16> to vector<8x120xbf16>
    %c5 = arith.constant 5 : index
    %c0_57 = arith.constant 0 : index
    %c0_58 = arith.constant 0 : index
    %71 = vector.load %arg6[%c5, %c0_57, %c0_58] : memref<15x120x128xbf16, #tpu.memory_space<vmem>>, vector<1x120x128xbf16>
    %72 = vector.shape_cast %71 : vector<1x120x128xbf16> to vector<120x128xbf16>
    %cst_59 = arith.constant dense<0.000000e+00> : vector<8x128xf32>
    %73 = tpu.matmul %70, %72, %cst_59 {dimension_numbers = #tpu.dot_dimension_numbers<[1], [0], [0], [1], [0, 0, 1, 1], [], []>} : vector<8x120xbf16>, vector<120x128xbf16>, vector<8x128xf32> -> vector<8x128xf32>
    %74 = arith.addf %69, %73 : vector<8x128xf32>
    %75 = vector.extract_strided_slice %45 {offsets = [48, 0], sizes = [8, 120], strides = [1, 1]} : vector<120x120xbf16> to vector<8x120xbf16>
    %c6 = arith.constant 6 : index
    %c0_60 = arith.constant 0 : index
    %c0_61 = arith.constant 0 : index
    %76 = vector.load %arg6[%c6, %c0_60, %c0_61] : memref<15x120x128xbf16, #tpu.memory_space<vmem>>, vector<1x120x128xbf16>
    %77 = vector.shape_cast %76 : vector<1x120x128xbf16> to vector<120x128xbf16>
    %cst_62 = arith.constant dense<0.000000e+00> : vector<8x128xf32>
    %78 = tpu.matmul %75, %77, %cst_62 {dimension_numbers = #tpu.dot_dimension_numbers<[1], [0], [0], [1], [0, 0, 1, 1], [], []>} : vector<8x120xbf16>, vector<120x128xbf16>, vector<8x128xf32> -> vector<8x128xf32>
    %79 = arith.addf %74, %78 : vector<8x128xf32>
    %80 = vector.extract_strided_slice %45 {offsets = [56, 0], sizes = [8, 120], strides = [1, 1]} : vector<120x120xbf16> to vector<8x120xbf16>
    %c7 = arith.constant 7 : index
    %c0_63 = arith.constant 0 : index
    %c0_64 = arith.constant 0 : index
    %81 = vector.load %arg6[%c7, %c0_63, %c0_64] : memref<15x120x128xbf16, #tpu.memory_space<vmem>>, vector<1x120x128xbf16>
    %82 = vector.shape_cast %81 : vector<1x120x128xbf16> to vector<120x128xbf16>
    %cst_65 = arith.constant dense<0.000000e+00> : vector<8x128xf32>
    %83 = tpu.matmul %80, %82, %cst_65 {dimension_numbers = #tpu.dot_dimension_numbers<[1], [0], [0], [1], [0, 0, 1, 1], [], []>} : vector<8x120xbf16>, vector<120x128xbf16>, vector<8x128xf32> -> vector<8x128xf32>
    %84 = arith.addf %79, %83 : vector<8x128xf32>
    %85 = vector.extract_strided_slice %45 {offsets = [64, 0], sizes = [8, 120], strides = [1, 1]} : vector<120x120xbf16> to vector<8x120xbf16>
    %c8_66 = arith.constant 8 : index
    %c0_67 = arith.constant 0 : index
    %c0_68 = arith.constant 0 : index
    %86 = vector.load %arg6[%c8_66, %c0_67, %c0_68] : memref<15x120x128xbf16, #tpu.memory_space<vmem>>, vector<1x120x128xbf16>
    %87 = vector.shape_cast %86 : vector<1x120x128xbf16> to vector<120x128xbf16>
    %cst_69 = arith.constant dense<0.000000e+00> : vector<8x128xf32>
    %88 = tpu.matmul %85, %87, %cst_69 {dimension_numbers = #tpu.dot_dimension_numbers<[1], [0], [0], [1], [0, 0, 1, 1], [], []>} : vector<8x120xbf16>, vector<120x128xbf16>, vector<8x128xf32> -> vector<8x128xf32>
    %89 = arith.addf %84, %88 : vector<8x128xf32>
    %90 = vector.extract_strided_slice %45 {offsets = [72, 0], sizes = [8, 120], strides = [1, 1]} : vector<120x120xbf16> to vector<8x120xbf16>
    %c9 = arith.constant 9 : index
    %c0_70 = arith.constant 0 : index
    %c0_71 = arith.constant 0 : index
    %91 = vector.load %arg6[%c9, %c0_70, %c0_71] : memref<15x120x128xbf16, #tpu.memory_space<vmem>>, vector<1x120x128xbf16>
    %92 = vector.shape_cast %91 : vector<1x120x128xbf16> to vector<120x128xbf16>
    %cst_72 = arith.constant dense<0.000000e+00> : vector<8x128xf32>
    %93 = tpu.matmul %90, %92, %cst_72 {dimension_numbers = #tpu.dot_dimension_numbers<[1], [0], [0], [1], [0, 0, 1, 1], [], []>} : vector<8x120xbf16>, vector<120x128xbf16>, vector<8x128xf32> -> vector<8x128xf32>
    %94 = arith.addf %89, %93 : vector<8x128xf32>
    %95 = vector.extract_strided_slice %45 {offsets = [80, 0], sizes = [8, 120], strides = [1, 1]} : vector<120x120xbf16> to vector<8x120xbf16>
    %c10 = arith.constant 10 : index
    %c0_73 = arith.constant 0 : index
    %c0_74 = arith.constant 0 : index
    %96 = vector.load %arg6[%c10, %c0_73, %c0_74] : memref<15x120x128xbf16, #tpu.memory_space<vmem>>, vector<1x120x128xbf16>
    %97 = vector.shape_cast %96 : vector<1x120x128xbf16> to vector<120x128xbf16>
    %cst_75 = arith.constant dense<0.000000e+00> : vector<8x128xf32>
    %98 = tpu.matmul %95, %97, %cst_75 {dimension_numbers = #tpu.dot_dimension_numbers<[1], [0], [0], [1], [0, 0, 1, 1], [], []>} : vector<8x120xbf16>, vector<120x128xbf16>, vector<8x128xf32> -> vector<8x128xf32>
    %99 = arith.addf %94, %98 : vector<8x128xf32>
    %100 = vector.extract_strided_slice %45 {offsets = [88, 0], sizes = [8, 120], strides = [1, 1]} : vector<120x120xbf16> to vector<8x120xbf16>
    %c11 = arith.constant 11 : index
    %c0_76 = arith.constant 0 : index
    %c0_77 = arith.constant 0 : index
    %101 = vector.load %arg6[%c11, %c0_76, %c0_77] : memref<15x120x128xbf16, #tpu.memory_space<vmem>>, vector<1x120x128xbf16>
    %102 = vector.shape_cast %101 : vector<1x120x128xbf16> to vector<120x128xbf16>
    %cst_78 = arith.constant dense<0.000000e+00> : vector<8x128xf32>
    %103 = tpu.matmul %100, %102, %cst_78 {dimension_numbers = #tpu.dot_dimension_numbers<[1], [0], [0], [1], [0, 0, 1, 1], [], []>} : vector<8x120xbf16>, vector<120x128xbf16>, vector<8x128xf32> -> vector<8x128xf32>
    %104 = arith.addf %99, %103 : vector<8x128xf32>
    %105 = vector.extract_strided_slice %45 {offsets = [96, 0], sizes = [8, 120], strides = [1, 1]} : vector<120x120xbf16> to vector<8x120xbf16>
    %c12 = arith.constant 12 : index
    %c0_79 = arith.constant 0 : index
    %c0_80 = arith.constant 0 : index
    %106 = vector.load %arg6[%c12, %c0_79, %c0_80] : memref<15x120x128xbf16, #tpu.memory_space<vmem>>, vector<1x120x128xbf16>
    %107 = vector.shape_cast %106 : vector<1x120x128xbf16> to vector<120x128xbf16>
    %cst_81 = arith.constant dense<0.000000e+00> : vector<8x128xf32>
    %108 = tpu.matmul %105, %107, %cst_81 {dimension_numbers = #tpu.dot_dimension_numbers<[1], [0], [0], [1], [0, 0, 1, 1], [], []>} : vector<8x120xbf16>, vector<120x128xbf16>, vector<8x128xf32> -> vector<8x128xf32>
    %109 = arith.addf %104, %108 : vector<8x128xf32>
    %110 = vector.extract_strided_slice %45 {offsets = [104, 0], sizes = [8, 120], strides = [1, 1]} : vector<120x120xbf16> to vector<8x120xbf16>
    %c13 = arith.constant 13 : index
    %c0_82 = arith.constant 0 : index
    %c0_83 = arith.constant 0 : index
    %111 = vector.load %arg6[%c13, %c0_82, %c0_83] : memref<15x120x128xbf16, #tpu.memory_space<vmem>>, vector<1x120x128xbf16>
    %112 = vector.shape_cast %111 : vector<1x120x128xbf16> to vector<120x128xbf16>
    %cst_84 = arith.constant dense<0.000000e+00> : vector<8x128xf32>
    %113 = tpu.matmul %110, %112, %cst_84 {dimension_numbers = #tpu.dot_dimension_numbers<[1], [0], [0], [1], [0, 0, 1, 1], [], []>} : vector<8x120xbf16>, vector<120x128xbf16>, vector<8x128xf32> -> vector<8x128xf32>
    %114 = arith.addf %109, %113 : vector<8x128xf32>
    %115 = vector.extract_strided_slice %45 {offsets = [112, 0], sizes = [8, 120], strides = [1, 1]} : vector<120x120xbf16> to vector<8x120xbf16>
    %c14 = arith.constant 14 : index
    %c0_85 = arith.constant 0 : index
    %c0_86 = arith.constant 0 : index
    %116 = vector.load %arg6[%c14, %c0_85, %c0_86] : memref<15x120x128xbf16, #tpu.memory_space<vmem>>, vector<1x120x128xbf16>
    %117 = vector.shape_cast %116 : vector<1x120x128xbf16> to vector<120x128xbf16>
    %cst_87 = arith.constant dense<0.000000e+00> : vector<8x128xf32>
    %118 = tpu.matmul %115, %117, %cst_87 {dimension_numbers = #tpu.dot_dimension_numbers<[1], [0], [0], [1], [0, 0, 1, 1], [], []>} : vector<8x120xbf16>, vector<120x128xbf16>, vector<8x128xf32> -> vector<8x128xf32>
    %119 = arith.addf %114, %118 : vector<8x128xf32>
    %c0_88 = arith.constant 0 : index
    %c0_89 = arith.constant 0 : index
    %120 = vector.load %arg7[%c0_88, %c0_89] : memref<1x128xf32, #tpu.memory_space<vmem>>, vector<1x128xf32>
    %121 = vector.broadcast %120 : vector<1x128xf32> to vector<8x128xf32>
    %122 = arith.addf %119, %121 : vector<8x128xf32>
    %c0_90 = arith.constant 0 : index
    %c0_91 = arith.constant 0 : index
    %123 = vector.load %arg8[%c0_90, %c0_91] : memref<8x128xf32, #tpu.memory_space<vmem>>, vector<8x128xf32>
    tpu.vector_store %arg8[%c0_90, %c0_91], %122 {strides = array<i32>} : memref<8x128xf32, #tpu.memory_space<vmem>>, vector<8x128xf32>,
    return
  }
  func.func @transform_0(%arg0: i32) -> (i32, i32, i32) {
    %c0_i32 = arith.constant 0 : i32
    %c0_i32_0 = arith.constant 0 : i32
    %c0_i32_1 = arith.constant 0 : i32
    return %c0_i32, %arg0, %c0_i32_0 : i32, i32, i32
  }
  func.func @transform_1(%arg0: i32) -> (i32, i32, i32) {
    %c0_i32 = arith.constant 0 : i32
    %c0_i32_0 = arith.constant 0 : i32
    %c0_i32_1 = arith.constant 0 : i32
    %c0_i32_2 = arith.constant 0 : i32
    return %c0_i32, %c0_i32_0, %c0_i32_1 : i32, i32, i32
  }
  func.func @transform_2(%arg0: i32) -> (i32, i32) {
    %c0_i32 = arith.constant 0 : i32
    %c0_i32_0 = arith.constant 0 : i32
    %c0_i32_1 = arith.constant 0 : i32
    return %c0_i32, %c0_i32_0 : i32, i32
  }
  func.func @transform_3(%arg0: i32) -> (i32, i32, i32) {
    %c0_i32 = arith.constant 0 : i32
    %c0_i32_0 = arith.constant 0 : i32
    %c0_i32_1 = arith.constant 0 : i32
    %c0_i32_2 = arith.constant 0 : i32
    return %c0_i32, %c0_i32_0, %c0_i32_1 : i32, i32, i32
  }
  func.func @transform_4(%arg0: i32) -> (i32, i32) {
    %c0_i32 = arith.constant 0 : i32
    %c0_i32_0 = arith.constant 0 : i32
    %c0_i32_1 = arith.constant 0 : i32
    return %c0_i32, %c0_i32_0 : i32, i32
  }
  func.func @transform_5(%arg0: i32) -> (i32, i32, i32) {
    %c0_i32 = arith.constant 0 : i32
    %c0_i32_0 = arith.constant 0 : i32
    %c0_i32_1 = arith.constant 0 : i32
    %c0_i32_2 = arith.constant 0 : i32
    return %c0_i32, %c0_i32_0, %c0_i32_1 : i32, i32, i32
  }
  func.func @transform_6(%arg0: i32) -> (i32, i32) {
    %c0_i32 = arith.constant 0 : i32
    %c0_i32_0 = arith.constant 0 : i32
    %c0_i32_1 = arith.constant 0 : i32
    return %c0_i32, %c0_i32_0 : i32, i32
  }
  func.func @transform_7(%arg0: i32) -> (i32, i32) {
    %c0_i32 = arith.constant 0 : i32
    %c0_i32_0 = arith.constant 0 : i32
    return %arg0, %c0_i32 : i32, i32
  }
}

</mosaic_0001>

<bundles_post_ra>
// kernel: cnn_actor_critic_forward.1
= control target key start
LH: loop header
LB: loop body
LE: loop exit
PB: predicated region body
PF: predicated region fallthrough
CT: control target
= control target key end

     0   :  { %12 = vsyncpa [#allocation4], 0  ;;  %s3335_s27 = smov [#allocation3]   ;;  %s3336_s29 = smov 64   ;;  %s3694_s0 = inlined_call_operand.vmem [shape: bf16[17,8,60], index: 0, kind: input, shape index: {}]   ;;  %s3695_s1 = inlined_call_operand.vmem [shape: bf16[3,60,120], index: 1, kind: input, shape index: {}]   ;;  %s3696_s2 = inlined_call_operand.vmem [shape: f32[1,120], index: 2, kind: input, shape index: {}]   ;;  %s3697_s3 = inlined_call_operand.vmem [shape: bf16[3,120,120], index: 3, kind: input, shape index: {}]   ;;  %s3698_s4 = inlined_call_operand.vmem [shape: f32[1,120], index: 4, kind: input, shape index: {}]   ;;  %s3699_s5 = inlined_call_operand.hbm [shape: bf16[15,120,128], index: 5, kind: input, shape index: {}]   ;;  %s3700_s6 = inlined_call_operand.vmem [shape: f32[1,128], index: 6, kind: input, shape index: {}]   ;;  %s3701_s7 = inlined_call_operand.vmem [shape: f32[8,128], index: 7, kind: output, shape index: {}]  }
   0x1   :  { %s27_s26 = sshll.u32 %s3699_s5, 4  ;;  %s29_s28 = sshll.u32 %s3335_s27, 4  ;;  %s28_s26 = int_to_ptr.hbm [resolvable:$true] %s27_s26  ;;  %s30_s28 = int_to_ptr.vmem [resolvable:$true] %s29_s28 }
   0x2   :  { %s3337_s30 = smov 4  }
   0x3   :  { %35 = dma.hbm_to_vmem [thread:$0]  %s28_s26, 14400, %s30_s28, [#allocation4], %s3336_s29, %s3336_s29, %s3337_s30  }
   0x4   :  { %3333 = dma.done.wait [#allocation4], 14400  }
   0x5   :  { %3334 = vsyncadd [#allocation4], 4294952896  ;;  %vm163_vm0 = vcmask 1045504   ;;  %v2333_v0 = vld [vmem:[%s3695_s1 + $0x38] sm:$0xf]  ;;  %v3006_v12 = vld [vmem:[%s3695_s1 + $0x30] sm:$0xff] }
   0x6   :  { %v3007_v1 = vld [vmem:[%s3695_s1 + $0x38] sm:$0x30]  ;;  %v2357_v2 = vld [vmem:[%s3695_s1 + $0x18] sm:$0xf]  ;;  %v3002_v13 = vld [vmem:[%s3695_s1 + $0x10] sm:$0xff]  ;;  %vm138_vm1 = vcmask 490496  }
   0x7   :  { %v2334_v3 = vor.u32 %v3007_v1, %v2333_v0  ;;  %v3003_v4 = vld [vmem:[%s3695_s1 + $0x18] sm:$0x30]  ;;  %v2389_v5 = vld [vmem:[%s3695_s1 + $0x58] sm:$0xf]  ;;  %v3010_v14 = vld [vmem:[%s3695_s1 + $0x50] sm:$0xff]  ;;  %vm653_vm2 = vcmask 1043456  }
   0x8   :  { %v3011_v6 = vld [vmem:[%s3695_s1 + $0x58] sm:$0x30]  ;;  %v2358_v7 = vor.u32 %v3003_v4, %v2357_v2  ;;  %v3005_v15 = vld [vmem:[%s3695_s1 + $0x28] sm:$0xff]  ;;  %v3004_v18 = vld [vmem:[%s3695_s1 + $0x20] sm:$0xff]  ;;  %vm480_vm3 = vcmask 977920   ;;  %vm628_vm4 = vcmask 982016  }
   0x9   :  { %v2390_v8 = vor.u32 %v3011_v6, %v2389_v5  ;;  %v165_v9 = vsel %vm163_vm0, %v2334_v3, 0  ;;  %v3001_v16 = vld [vmem:[%s3695_s1 + $0x8] sm:$0xff]  ;;  %v3000_v19 = vld [vmem:[%s3695_s1] sm:$0xff]  ;;  %v3206_v25 = vld [vmem:[%s3694_s0 + $0x10] sm:$0xff]  }
   0xa   :  { %171 = vmatpush.bf16.msra.mxu0 %v165_v9  ;;  %v273_v10 = vsel %vm163_vm0, %v2358_v7, 0  ;;  %v3009_v17 = vld [vmem:[%s3695_s1 + $0x48] sm:$0xff]  ;;  %v3008_v20 = vld [vmem:[%s3695_s1 + $0x40] sm:$0xff]  ;;  %v527_v26 = vld [vmem:[%s3697_s3 + $0x38] sm:$0xf]  ;;  %v3338_v7 = vmov 0  }
   0xb   :  { %v366_v11 = vsel %vm163_vm0, %v2390_v8, 0  ;;  %279 = vmatpush.bf16.msra.mxu1 %v273_v10  ;;  %v3280_v21 = vld [vmem:[%s3694_s0 + $0x4] sm:$0xff]   ;;  %v3282_v24 = vld [vmem:[%s3694_s0 + $0xc] sm:$0xff]   ;;  %v744_v28 = vunpack.c.l.b16 %v527_v26  ;;  %v3284_v34 = vld [vmem:[%s3694_s0 + $0x14] sm:$0xff]   ;;  %481 = vst.msk [vmem:[#allocation2] sm:$0xf] %vm480_vm3, %v3338_v7 }
   0xc   :  { %372 = vmatpush.bf16.msra.mxu2 %v366_v11  ;;  %v3146_v22 = vld [vmem:[%s3694_s0] sm:$0xff]   ;;  %v3205_v23 = vld [vmem:[%s3694_s0 + $0x8] sm:$0xff]   ;;  %v2500_v27 = vld [vmem:[%s3697_s3 + $0xb0] sm:$0xf]  ;;  %482 = vst.msk [vmem:[#allocation2 + $0x40] sm:$0xf] %vm480_vm3, %v3338_v7 }
   0xd   :  { %v933_v29 = vunpack.c.l.b16 %v2500_v27  ;;  %v752_v30 = vpack.c.b16 %v744_v28, %v744_v28  ;;  %v3207_v35 = vld [vmem:[%s3694_s0 + $0x18] sm:$0xff]   ;;  %v3018_v36 = vld [vmem:[%s3697_s3 + $0x30] sm:$0xff]  ;;  %v3039_v37 = vld [vmem:[%s3697_s3 + $0xa8] sm:$0xff] }
   0xe   :  { %172 = vmatpush.bf16.msra.mxu0 %v3006_v12  ;;  %v3286_v38 = vld [vmem:[%s3694_s0 + $0x1c] sm:$0xff]   ;;  %v3017_v40 = vld [vmem:[%s3697_s3 + $0x28] sm:$0xff]  ;;  %v3210_v47 = vld [vmem:[%s3694_s0 + $0x30] sm:$0xff]  }
   0xf   :  { %280 = vmatpush.bf16.msra.mxu1 %v3002_v13  ;;  %v941_v31 = vpack.c.b16 %v933_v29, %v933_v29  ;;  %v785_v32 = vsel %vm653_vm2, %v752_v30, 0  ;;  %v3208_v39 = vld [vmem:[%s3694_s0 + $0x20] sm:$0xff]   ;;  %v3209_v43 = vld [vmem:[%s3694_s0 + $0x28] sm:$0xff]   ;;  %v3037_v45 = vld [vmem:[%s3697_s3 + $0x98] sm:$0xff]  ;;  %v3172_v51 = vunpack.c.h.b16 %v3210_v47 }
  0x10   :  { %373 = vmatpush.bf16.msra.mxu2 %v3010_v14  ;;  %v3038_v41 = vld [vmem:[%s3697_s3 + $0xa0] sm:$0xff]  ;;  %v3289_v46 = vld [vmem:[%s3694_s0 + $0x2c] sm:$0xff]   ;;  %v3015_v48 = vld [vmem:[%s3697_s3 + $0x18] sm:$0xff] }
  0x11   :  { %v974_v33 = vsel %vm653_vm2, %v941_v31, 0  ;;  %v3288_v42 = vld [vmem:[%s3694_s0 + $0x24] sm:$0xff]   ;;  %v3036_v49 = vld [vmem:[%s3697_s3 + $0x90] sm:$0xff]  ;;  %v3211_v50 = vld [vmem:[%s3694_s0 + $0x38] sm:$0xff]  }
  0x12   :  { %173 = vmatpush.bf16.msra.mxu0 %v3005_v15  ;;  %v3016_v44 = vld [vmem:[%s3697_s3 + $0x20] sm:$0xff]  ;;  %v3175_v52 = vunpack.c.l.b16 %v3211_v50  ;;  %v2413_v53 = vld [vmem:[%s3697_s3 + $0x74] sm:$0xf]  ;;  %v3025_v59 = vld [vmem:[%s3697_s3 + $0x6c] sm:$0xff]  ;;  %v3176_v62 = vunpack.c.h.b16 %v3211_v50 }
  0x13   :  { %281 = vmatpush.bf16.msra.mxu1 %v3001_v16  ;;  %v612_v54 = vunpack.c.l.b16 %v2413_v53  ;;  %v3014_v58 = vld [vmem:[%s3697_s3 + $0x10] sm:$0xff]  ;;  %v3024_v60 = vld [vmem:[%s3697_s3 + $0x64] sm:$0xff]  ;;  %v59_v61 = vld [vmem:[%s3694_s0 + $0x40] sm:$0xf] }
  0x14   :  { %374 = vmatpush.bf16.msra.mxu2 %v3009_v17  ;;  %v113_v55 = vpack.c.b16 %v3175_v52, %v3172_v51  ;;  %v333_v63 = vunpack.c.l.b16 %v59_v61  ;;  %v3023_v0 = vld [vmem:[%s3697_s3 + $0x5c] sm:$0xff]  ;;  %v114_v1 = vpack.c.b16 %v3176_v62, %v3176_v62  ;;  %v3013_v2 = vld [vmem:[%s3697_s3 + $0x8] sm:$0xff]  ;;  %v224_v4 = vpack.c.b16 %v3175_v52, %v3175_v52  ;;  %v3022_v6 = vld [vmem:[%s3697_s3 + $0x54] sm:$0xff] }
  0x15   :  { %v620_v56 = vpack.c.b16 %v612_v54, %v612_v54  ;;  %v3035_v5 = vld [vmem:[%s3697_s3 + $0x88] sm:$0xff]  ;;  %v3012_v8 = vld [vmem:[%s3697_s3] sm:$0xff]  ;;  %v3033_v16 = vld [vmem:[%s3697_s3 + $0x78] sm:$0xff] }
  0x16   :  { %174 = vmatpush.bf16.msra.mxu0 %v3004_v18  ;;  %v335_v3 = vpack.c.b16 %v333_v63, %v333_v63  ;;  %v3021_v9 = vld [vmem:[%s3697_s3 + $0x4c] sm:$0xff]  ;;  %v3020_v10 = vld [vmem:[%s3697_s3 + $0x44] sm:$0xff]  ;;  %v3019_v11 = vld [vmem:[%s3697_s3 + $0x3c] sm:$0xff] }
  0x17   :  { %282 = vmatpush.bf16.msra.mxu1 %v3000_v19  ;;  %v655_v57 = vsel %vm653_vm2, %v620_v56, 0  ;;  %v3034_v13 = vld [vmem:[%s3697_s3 + $0x80] sm:$0xff] }
  0x18   :  { %375 = vmatpush.bf16.msra.mxu2 %v3008_v20  ;;  %657 = vmatpush.bf16.msra.mxu3 %v655_v57  ;;  %v3576_v17 = vld [vmem:[%s3696_s2] ss:$0 sm:$0xff] }
  0x19   :  { %2335 = vmatmul.msk.bf16.vlgmr.msra.gmra.mxu0 %vm138_vm1, %v3280_v21 }
  0x1a   :  { %2359 = vmatmul.msk.bf16.vlgmr.msra.gmra.mxu1 %vm138_vm1, %v3146_v22  ;;  %787 = vmatpush.bf16.msrb.mxu0 %v785_v32 }
  0x1b   :  { %2391 = vmatmul.msk.bf16.vlgmr.msra.gmra.mxu2 %vm138_vm1, %v3205_v23  ;;  %976 = vmatpush.bf16.msrb.mxu1 %v974_v33 }
  0x1c   :  { %658 = vmatpush.bf16.msra.mxu3 %v3025_v59 }
  0x1e   :  { %788 = vmatpush.bf16.msrb.mxu0 %v3018_v36 }
  0x1f   :  { %977 = vmatpush.bf16.msrb.mxu1 %v3039_v37 }
  0x20   :  { %659 = vmatpush.bf16.msra.mxu3 %v3024_v60 }
  0x22   :  { %789 = vmatpush.bf16.msrb.mxu0 %v3017_v40 }
  0x23   :  { %978 = vmatpush.bf16.msrb.mxu1 %v3038_v41 }
  0x24   :  { %660 = vmatpush.bf16.msra.mxu3 %v3023_v0 }
  0x26   :  { %790 = vmatpush.bf16.msrb.mxu0 %v3016_v44 }
  0x27   :  { %979 = vmatpush.bf16.msrb.mxu1 %v3037_v45 }
  0x28   :  { %661 = vmatpush.bf16.msra.mxu3 %v3022_v6 }
  0x29   :  { %2336 = vmatmul.msk.bf16.gmra.mxu0 %vm138_vm1, %v3282_v24 }
  0x2a   :  { %2360 = vmatmul.msk.bf16.gmra.mxu1 %vm138_vm1, %v3205_v23  ;;  %791 = vmatpush.bf16.msrb.mxu0 %v3015_v48 }
  0x2b   :  { %2392 = vmatmul.msk.bf16.gmra.mxu2 %vm138_vm1, %v3206_v25  ;;  %980 = vmatpush.bf16.msrb.mxu1 %v3036_v49 }
  0x2c   :  { %662 = vmatpush.bf16.msra.mxu3 %v3021_v9 }
  0x2e   :  { %792 = vmatpush.bf16.msrb.mxu0 %v3014_v58 }
  0x2f   :  { %981 = vmatpush.bf16.msrb.mxu1 %v3035_v5 }
  0x30   :  { %663 = vmatpush.bf16.msra.mxu3 %v3020_v10 }
  0x32   :  { %793 = vmatpush.bf16.msrb.mxu0 %v3013_v2 }
  0x33   :  { %982 = vmatpush.bf16.msrb.mxu1 %v3034_v13 }
  0x34   :  { %664 = vmatpush.bf16.msra.mxu3 %v3019_v11 }
  0x36   :  { %794 = vmatpush.bf16.msrb.mxu0 %v3012_v8 }
  0x37   :  { %983 = vmatpush.bf16.msrb.mxu1 %v3033_v16 }
  0x39   :  { %2337 = vmatmul.msk.bf16.gmra.mxu0 %vm138_vm1, %v3284_v34 }
  0x3a   :  { %2361 = vmatmul.msk.bf16.gmra.mxu1 %vm138_vm1, %v3206_v25 }
  0x3b   :  { %2393 = vmatmul.msk.bf16.gmra.mxu2 %vm138_vm1, %v3207_v35 }
  0x49   :  { %2338 = vmatmul.msk.bf16.gmra.mxu0 %vm138_vm1, %v3286_v38 }
  0x4a   :  { %2362 = vmatmul.msk.bf16.gmra.mxu1 %vm138_vm1, %v3207_v35 }
  0x4b   :  { %2394 = vmatmul.msk.bf16.gmra.mxu2 %vm138_vm1, %v3208_v39 }
  0x59   :  { %2339 = vmatmul.msk.bf16.gmra.mxu0 %vm138_vm1, %v3288_v42 }
  0x5a   :  { %2363 = vmatmul.msk.bf16.gmra.mxu1 %vm138_vm1, %v3208_v39 }
  0x5b   :  { %2395 = vmatmul.msk.bf16.gmra.mxu2 %vm138_vm1, %v3209_v43 }
  0x69   :  { %2340 = vmatmul.msk.bf16.gmra.mxu0 %vm138_vm1, %v3289_v46 }
  0x6a   :  { %2364 = vmatmul.msk.bf16.gmra.mxu1 %vm138_vm1, %v3209_v43 }
  0x6b   :  { %2396 = vmatmul.msk.bf16.gmra.mxu2 %vm138_vm1, %v3210_v47 }
  0x79   :  { %2341 = vmatmul.msk.bf16.gmra.mxu0 %vm138_vm1, %v113_v55 }
  0x7a   :  { %2365 = vmatmul.msk.bf16.gmra.mxu1 %vm138_vm1, %v3210_v47 }
  0x7b   :  { %2397 = vmatmul.msk.bf16.gmra.mxu2 %vm138_vm1, %v3211_v50 }
  0x89   :  { %2342 = vmatmul.msk.bf16.gmra.mxu0 %vm138_vm1, %v114_v1 }
  0x8a   :  { %2366 = vmatmul.msk.bf16.gmra.mxu1 %vm138_vm1, %v224_v4 }
  0x8b   :  { %2398 = vmatmul.msk.bf16.gmra.mxu2 %vm138_vm1, %v335_v3 }
  0x96   :  { %v176_v12 = vpop.f32.mrf.mxu0 }
  0x97   :  { %v284_v14 = vpop.f32.mrf.mxu1 }
  0x98   :  { %v285_v15 = vadd.f32 %v284_v14, %v176_v12 }
  0x9e   :  { %v377_v18 = vpop.f32.mrf.mxu2  ;;  %v178_v20 = vpop.f32.mrf.mxu0 }
  0x9f   :  { %v416_v19 = vadd.f32 %v377_v18, %v285_v15  ;;  %v286_v21 = vpop.f32.mrf.mxu1 }
  0xa0   :  { %v287_v25 = vadd.f32 %v286_v21, %v178_v20 }
  0xa1   :  { %v435_v22 = vadd.f32 %v3576_v17, %v416_v19 }
  0xa3   :  { %v450_v23 = vmax.f32 %v435_v22, 0.0  ;;  %v1118_v22 = vld [vmem:[#allocation3 + $0x74] sm:$0xf] }
  0xa5   :  { %v465_v24 = vpack.c.bf16 %v450_v23, %v450_v23 }
  0xa6   :  { %v379_v26 = vpop.f32.mrf.mxu2  ;;  %v181_v28 = vpop.f32.mrf.mxu0 }
  0xa7   :  { %483 = vst.msk [vmem:[#allocation2 + $0x4] sm:$0xf] %vm480_vm3, %v465_v24  ;;  %v417_v27 = vadd.f32 %v379_v26, %v287_v25  ;;  %v289_v29 = vpop.f32.mrf.mxu1  ;;  %v1148_v24 = vunpack.c.l.b16 %v1118_v22  ;;  %v3042_v22 = vld [vmem:[#allocation3 + $0x10] sm:$0xff] }
  0xa8   :  { %v290_v32 = vadd.f32 %v289_v29, %v181_v28 }
  0xa9   :  { %v436_v30 = vadd.f32 %v3576_v17, %v417_v27  ;;  %v1156_v26 = vpack.c.b16 %v1148_v24, %v1148_v24 }
  0xab   :  { %v451_v31 = vmax.f32 %v436_v30, 0.0  ;;  %v1168_v29 = vsel %vm653_vm2, %v1156_v26, 0  ;;  %v3041_v26 = vld [vmem:[#allocation3 + $0x8] sm:$0xff] }
  0xac   :  { %1170 = vmatpush.bf16.msrb.mxu2 %v1168_v29  ;;  %v3049_v29 = vld [vmem:[#allocation3 + $0x4c] sm:$0xff] }
  0xad   :  { %v466_v33 = vpack.c.bf16 %v451_v31, %v451_v31 }
  0xae   :  { %v382_v34 = vpop.f32.mrf.mxu2  ;;  %v3178_v35 = vld [vmem:[#allocation2] sm:$0xff]   ;;  %v183_v37 = vpop.f32.mrf.mxu0 }
  0xaf   :  { %484 = vst.msk [vmem:[#allocation2 + $0x8] sm:$0xf] %vm480_vm3, %v466_v33  ;;  %v418_v36 = vadd.f32 %v382_v34, %v290_v32  ;;  %2478 = vmatmul.msk.bf16.vlgmr.msrb.gmra.mxu0 %vm628_vm4, %v3178_v35  ;;  %v291_v38 = vpop.f32.mrf.mxu1 }
  0xb0   :  { %v292_v42 = vadd.f32 %v291_v38, %v183_v37 }
  0xb1   :  { %v437_v39 = vadd.f32 %v3576_v17, %v418_v36 }
  0xb3   :  { %v452_v40 = vmax.f32 %v437_v39, 0.0 }
  0xb5   :  { %v467_v41 = vpack.c.bf16 %v452_v40, %v452_v40 }
  0xb6   :  { %v384_v43 = vpop.f32.mrf.mxu2  ;;  %v3292_v44 = vld [vmem:[#allocation2 + $0x4] sm:$0xff]   ;;  %v186_v46 = vpop.f32.mrf.mxu0 }
  0xb7   :  { %485 = vst.msk [vmem:[#allocation2 + $0xc] sm:$0xf] %vm480_vm3, %v467_v41  ;;  %v419_v45 = vadd.f32 %v384_v43, %v292_v42  ;;  %2442 = vmatmul.msk.bf16.vlgmr.msra.gmra.mxu3 %vm628_vm4, %v3292_v44  ;;  %v294_v47 = vpop.f32.mrf.mxu1  ;;  %v1102_v43 = vld [vmem:[#allocation3 + $0x38] sm:$0xf] }
  0xb8   :  { %v295_v50 = vadd.f32 %v294_v47, %v186_v46  ;;  %v1212_v46 = vunpack.c.l.b16 %v1102_v43  ;;  %v3053_v47 = vld [vmem:[#allocation3 + $0x6c] sm:$0xff] }
  0xb9   :  { %v438_v48 = vadd.f32 %v3576_v17, %v419_v45  ;;  %1171 = vmatpush.bf16.msrb.mxu2 %v3053_v47 }
  0xbb   :  { %v453_v49 = vmax.f32 %v438_v48, 0.0 }
  0xbd   :  { %v468_v51 = vpack.c.bf16 %v453_v49, %v453_v49 }
  0xbe   :  { %v387_v52 = vpop.f32.mrf.mxu2  ;;  %v3212_v53 = vld [vmem:[#allocation2 + $0x8] sm:$0xff]   ;;  %v188_v56 = vpop.f32.mrf.mxu0 }
  0xbf   :  { %v3026_v54 = vld [vmem:[#allocation2 + $0x8] sm:$0xff]  ;;  %486 = vst.msk [vmem:[#allocation2 + $0x10] sm:$0xf] %vm480_vm3, %v468_v51  ;;  %v420_v55 = vadd.f32 %v387_v52, %v295_v50  ;;  %2479 = vmatmul.msk.bf16.gmra.mxu0 %vm628_vm4, %v3212_v53  ;;  %v296_v57 = vpop.f32.mrf.mxu1  ;;  %v1220_v50 = vpack.c.b16 %v1212_v46, %v1212_v46  ;;  %v1262_v46 = vld [vmem:[#allocation3 + $0xb0] sm:$0xf] }
  0xc0   :  { %2557 = vmatmul.msk.bf16.vlgmr.msrb.gmra.mxu1 %vm628_vm4, %v3026_v54  ;;  %v297_v61 = vadd.f32 %v296_v57, %v188_v56  ;;  %v1292_v47 = vunpack.c.l.b16 %v1262_v46  ;;  %v1424_v46 = vld [vmem:[#allocation3 + $0x128] sm:$0xf] }
  0xc1   :  { %v439_v58 = vadd.f32 %v3576_v17, %v420_v55  ;;  %v1232_v53 = vsel %vm653_vm2, %v1220_v50, 0 }
  0xc2   :  { %1234 = vmatpush.bf16.msrb.mxu3 %v1232_v53  ;;  %v1300_v53 = vpack.c.b16 %v1292_v47, %v1292_v47 }
  0xc3   :  { %v454_v59 = vmax.f32 %v439_v58, 0.0  ;;  %v3046_v58 = vld [vmem:[#allocation3 + $0x30] sm:$0xff] }
  0xc5   :  { %v469_v60 = vpack.c.bf16 %v454_v59, %v454_v59 }
  0xc6   :  { %v389_v62 = vpop.f32.mrf.mxu2  ;;  %v3294_v63 = vld [vmem:[#allocation2 + $0xc] sm:$0xff]   ;;  %v191_v1 = vpop.f32.mrf.mxu0  ;;  %1235 = vmatpush.bf16.msrb.mxu3 %v3046_v58  ;;  %v1312_v58 = vsel %vm653_vm2, %v1300_v53, 0  ;;  %v1454_v53 = vunpack.c.l.b16 %v1424_v46  ;;  %v3069_v46 = vld [vmem:[#allocation3 + $0xf8] sm:$0xff] }
  0xc7   :  { %487 = vst.msk [vmem:[#allocation2 + $0x14] sm:$0xf] %vm480_vm3, %v469_v60  ;;  %v421_v0 = vadd.f32 %v389_v62, %v297_v61  ;;  %2443 = vmatmul.msk.bf16.gmra.mxu3 %vm628_vm4, %v3294_v63  ;;  %v299_v2 = vpop.f32.mrf.mxu1  ;;  %v3045_v63 = vld [vmem:[#allocation3 + $0x28] sm:$0xff] }
  0xc8   :  { %v300_v5 = vadd.f32 %v299_v2, %v191_v1 }
  0xc9   :  { %v440_v3 = vadd.f32 %v3576_v17, %v421_v0 }
  0xca   :  { %1236 = vmatpush.bf16.msrb.mxu3 %v3045_v63  ;;  %v1748_v63 = vld [vmem:[#allocation3 + $0x218] sm:$0xf] }
  0xcb   :  { %v455_v4 = vmax.f32 %v440_v3, 0.0 }
  0xcd   :  { %v470_v6 = vpack.c.bf16 %v455_v4, %v455_v4 }
  0xce   :  { %v392_v7 = vpop.f32.mrf.mxu2  ;;  %v3213_v8 = vld [vmem:[#allocation2 + $0x10] sm:$0xff]   ;;  %v193_v11 = vpop.f32.mrf.mxu0 }
  0xcf   :  { %v3027_v9 = vld [vmem:[#allocation2 + $0x10] sm:$0xff]  ;;  %488 = vst.msk [vmem:[#allocation2 + $0x18] sm:$0xf] %vm480_vm3, %v470_v6  ;;  %v422_v10 = vadd.f32 %v392_v7, %v300_v5  ;;  %2480 = vmatmul.msk.bf16.gmra.mxu0 %vm628_vm4, %v3213_v8  ;;  %v301_v12 = vpop.f32.mrf.mxu1  ;;  %v3044_v5 = vld [vmem:[#allocation3 + $0x20] sm:$0xff] }
  0xd0   :  { %2558 = vmatmul.msk.bf16.gmra.mxu1 %vm628_vm4, %v3027_v9  ;;  %v302_v16 = vadd.f32 %v301_v12, %v193_v11  ;;  %v3052_v8 = vld [vmem:[#allocation3 + $0x64] sm:$0xff]  ;;  %1237 = vmatpush.bf16.msrb.mxu3 %v3044_v5  ;;  %v3043_v11 = vld [vmem:[#allocation3 + $0x18] sm:$0xff]  ;;  %v3064_v5 = vld [vmem:[#allocation3 + $0xcc] sm:$0xff] }
  0xd1   :  { %v441_v13 = vadd.f32 %v3576_v17, %v422_v10  ;;  %1172 = vmatpush.bf16.msrb.mxu2 %v3052_v8 }
  0xd3   :  { %v456_v14 = vmax.f32 %v441_v13, 0.0 }
  0xd4   :  { %1238 = vmatpush.bf16.msrb.mxu3 %v3043_v11  ;;  %v3063_v11 = vld [vmem:[#allocation3 + $0xc4] sm:$0xff] }
  0xd5   :  { %v471_v15 = vpack.c.bf16 %v456_v14, %v456_v14 }
  0xd6   :  { %v394_v18 = vpop.f32.mrf.mxu2  ;;  %v3296_v19 = vld [vmem:[#allocation2 + $0x14] sm:$0xff]   ;;  %v196_v21 = vpop.f32.mrf.mxu0 }
  0xd7   :  { %489 = vst.msk [vmem:[#allocation2 + $0x1c] sm:$0xf] %vm480_vm3, %v471_v15  ;;  %v423_v20 = vadd.f32 %v394_v18, %v302_v16  ;;  %2444 = vmatmul.msk.bf16.gmra.mxu3 %vm628_vm4, %v3296_v19  ;;  %v304_v23 = vpop.f32.mrf.mxu1  ;;  %v3051_v19 = vld [vmem:[#allocation3 + $0x5c] sm:$0xff] }
  0xd8   :  { %v305_v28 = vadd.f32 %v304_v23, %v196_v21  ;;  %1173 = vmatpush.bf16.msrb.mxu2 %v3051_v19  ;;  %1239 = vmatpush.bf16.msrb.mxu3 %v3042_v22  ;;  %v3061_v22 = vld [vmem:[#allocation3 + $0xb4] sm:$0xff] }
  0xd9   :  { %v442_v25 = vadd.f32 %v3576_v17, %v423_v20 }
  0xdb   :  { %v457_v27 = vmax.f32 %v442_v25, 0.0  ;;  %v3050_v25 = vld [vmem:[#allocation3 + $0x54] sm:$0xff] }
  0xdc   :  { %1174 = vmatpush.bf16.msrb.mxu2 %v3050_v25  ;;  %1240 = vmatpush.bf16.msrb.mxu3 %v3041_v26  ;;  %v3055_v25 = vld [vmem:[#allocation3 + $0x80] sm:$0xff] }
  0xdd   :  { %v472_v30 = vpack.c.bf16 %v457_v27, %v457_v27 }
  0xde   :  { %v397_v31 = vpop.f32.mrf.mxu2  ;;  %v3214_v32 = vld [vmem:[#allocation2 + $0x18] sm:$0xff]   ;;  %v198_v35 = vpop.f32.mrf.mxu0 }
  0xdf   :  { %v3028_v33 = vld [vmem:[#allocation2 + $0x18] sm:$0xff]  ;;  %490 = vst.msk [vmem:[#allocation2 + $0x20] sm:$0xf] %vm480_vm3, %v472_v30  ;;  %v424_v34 = vadd.f32 %v397_v31, %v305_v28  ;;  %2481 = vmatmul.msk.bf16.gmra.mxu0 %vm628_vm4, %v3214_v32  ;;  %v306_v36 = vpop.f32.mrf.mxu1  ;;  %v1343_v28 = vld [vmem:[#allocation3 + $0xec] sm:$0xf] }
  0xe0   :  { %2559 = vmatmul.msk.bf16.gmra.mxu1 %vm628_vm4, %v3028_v33  ;;  %v307_v40 = vadd.f32 %v306_v36, %v198_v35  ;;  %v1373_v30 = vunpack.c.l.b16 %v1343_v28  ;;  %v3040_v33 = vld [vmem:[#allocation3] sm:$0xff]  ;;  %1175 = vmatpush.bf16.msrb.mxu2 %v3049_v29  ;;  %v3102_v28 = vld [vmem:[#allocation3 + $0x210] sm:$0xff] }
  0xe1   :  { %v443_v37 = vadd.f32 %v3576_v17, %v424_v34  ;;  %1241 = vmatpush.bf16.msrb.mxu3 %v3040_v33  ;;  %v3109_v29 = vld [vmem:[#allocation3 + $0x24c] sm:$0xff] }
  0xe2   :  { %v1381_v36 = vpack.c.b16 %v1373_v30, %v1373_v30  ;;  %v3054_v30 = vld [vmem:[#allocation3 + $0x78] sm:$0xff] }
  0xe3   :  { %v458_v38 = vmax.f32 %v443_v37, 0.0 }
  0xe5   :  { %v473_v39 = vpack.c.bf16 %v458_v38, %v458_v38 }
  0xe6   :  { %v399_v41 = vpop.f32.mrf.mxu2  ;;  %v3298_v42 = vld [vmem:[#allocation2 + $0x1c] sm:$0xff]   ;;  %v201_v45 = vpop.f32.mrf.mxu0 }
  0xe7   :  { %491 = vst.msk [vmem:[#allocation2 + $0x24] sm:$0xf] %vm480_vm3, %v473_v39  ;;  %v425_v44 = vadd.f32 %v399_v41, %v307_v40  ;;  %2445 = vmatmul.msk.bf16.gmra.mxu3 %vm628_vm4, %v3298_v42  ;;  %v309_v48 = vpop.f32.mrf.mxu1  ;;  %v1393_v40 = vsel %vm653_vm2, %v1381_v36, 0  ;;  %v3048_v42 = vld [vmem:[#allocation3 + $0x44] sm:$0xff] }
  0xe8   :  { %v310_v52 = vadd.f32 %v309_v48, %v201_v45  ;;  %1395 = vmatpush.bf16.msra.mxu3 %v1393_v40  ;;  %v3067_v45 = vld [vmem:[#allocation3 + $0xe4] sm:$0xff]  ;;  %1176 = vmatpush.bf16.msrb.mxu2 %v3048_v42 }
  0xe9   :  { %v444_v49 = vadd.f32 %v3576_v17, %v425_v44  ;;  %v3101_v40 = vld [vmem:[#allocation3 + $0x208] sm:$0xff] }
  0xeb   :  { %v459_v51 = vmax.f32 %v444_v49, 0.0 }
  0xec   :  { %1396 = vmatpush.bf16.msra.mxu3 %v3067_v45 }
  0xed   :  { %v474_v54 = vpack.c.bf16 %v459_v51, %v459_v51 }
  0xee   :  { %v402_v55 = vpop.f32.mrf.mxu2  ;;  %v3215_v56 = vld [vmem:[#allocation2 + $0x20] sm:$0xff]   ;;  %v203_v60 = vpop.f32.mrf.mxu0 }
  0xef   :  { %v3029_v57 = vld [vmem:[#allocation2 + $0x20] sm:$0xff]  ;;  %492 = vst.msk [vmem:[#allocation2 + $0x28] sm:$0xf] %vm480_vm3, %v474_v54  ;;  %v426_v59 = vadd.f32 %v402_v55, %v310_v52  ;;  %2482 = vmatmul.msk.bf16.gmra.mxu0 %vm628_vm4, %v3215_v56  ;;  %v311_v61 = vpop.f32.mrf.mxu1 }
  0xf0   :  { %2560 = vmatmul.msk.bf16.gmra.mxu1 %vm628_vm4, %v3029_v57  ;;  %v312_v2 = vadd.f32 %v311_v61, %v203_v60  ;;  %v3047_v52 = vld [vmem:[#allocation3 + $0x3c] sm:$0xff]  ;;  %v3060_v61 = vld [vmem:[#allocation3 + $0xa8] sm:$0xff] }
  0xf1   :  { %v445_v62 = vadd.f32 %v3576_v17, %v426_v59  ;;  %v3066_v56 = vld [vmem:[#allocation3 + $0xdc] sm:$0xff]  ;;  %1177 = vmatpush.bf16.msrb.mxu2 %v3047_v52 }
  0xf2   :  { %1397 = vmatpush.bf16.msra.mxu3 %v3066_v56  ;;  %v3081_v56 = vld [vmem:[#allocation3 + $0x15c] sm:$0xff] }
  0xf3   :  { %v460_v0 = vmax.f32 %v445_v62, 0.0  ;;  %v3065_v62 = vld [vmem:[#allocation3 + $0xd4] sm:$0xff] }
  0xf5   :  { %v475_v1 = vpack.c.bf16 %v460_v0, %v460_v0  ;;  %1314 = vmatpush.bf16.msra.mxu2 %v1312_v58  ;;  %v1462_v58 = vpack.c.b16 %v1454_v53, %v1454_v53 }
  0xf6   :  { %v404_v3 = vpop.f32.mrf.mxu2  ;;  %v3300_v4 = vld [vmem:[#allocation2 + $0x24] sm:$0xff]   ;;  %v206_v7 = vpop.f32.mrf.mxu0  ;;  %1398 = vmatpush.bf16.msra.mxu3 %v3065_v62 }
  0xf7   :  { %493 = vst.msk [vmem:[#allocation2 + $0x2c] sm:$0xf] %vm480_vm3, %v475_v1  ;;  %v427_v6 = vadd.f32 %v404_v3, %v312_v2  ;;  %2446 = vmatmul.msk.bf16.gmra.mxu3 %vm628_vm4, %v3300_v4  ;;  %v314_v9 = vpop.f32.mrf.mxu1  ;;  %v3059_v1 = vld [vmem:[#allocation3 + $0xa0] sm:$0xff]  ;;  %v1778_v2 = vunpack.c.l.b16 %v1748_v63  ;;  %v1829_v3 = vld [vmem:[#allocation3 + $0x254] sm:$0xf] }
  0xf8   :  { %v315_v13 = vadd.f32 %v314_v9, %v206_v7 }
  0xf9   :  { %v446_v10 = vadd.f32 %v3576_v17, %v427_v6  ;;  %1315 = vmatpush.bf16.msra.mxu2 %v3060_v61  ;;  %v1859_v6 = vunpack.c.l.b16 %v1829_v3  ;;  %v1786_v7 = vpack.c.b16 %v1778_v2, %v1778_v2  ;;  %v3080_v61 = vld [vmem:[#allocation3 + $0x154] sm:$0xff]  ;;  %v3100_v2 = vld [vmem:[#allocation3 + $0x200] sm:$0xff] }
  0xfa   :  { %1399 = vmatpush.bf16.msra.mxu3 %v3064_v5  ;;  %v3107_v3 = vld [vmem:[#allocation3 + $0x23c] sm:$0xff] }
  0xfb   :  { %v461_v12 = vmax.f32 %v446_v10, 0.0  ;;  %v1867_v8 = vpack.c.b16 %v1859_v6, %v1859_v6  ;;  %v3058_v10 = vld [vmem:[#allocation3 + $0x98] sm:$0xff]  ;;  %v3074_v5 = vld [vmem:[#allocation3 + $0x120] sm:$0xff]  ;;  %v3079_v6 = vld [vmem:[#allocation3 + $0x14c] sm:$0xff] }
  0xfd   :  { %v476_v14 = vpack.c.bf16 %v461_v12, %v461_v12  ;;  %1316 = vmatpush.bf16.msra.mxu2 %v3059_v1  ;;  %v1879_v9 = vsel %vm653_vm2, %v1867_v8, 0  ;;  %v1474_v1 = vsel %vm653_vm2, %v1462_v58, 0  ;;  %v3094_v58 = vld [vmem:[#allocation3 + $0x1cc] sm:$0xff] }
  0xfe   :  { %v407_v15 = vpop.f32.mrf.mxu2  ;;  %v3216_v16 = vld [vmem:[#allocation2 + $0x28] sm:$0xff]   ;;  %v208_v21 = vpop.f32.mrf.mxu0  ;;  %1881 = vmatpush.bf16.msra.mxu1 %v1879_v9  ;;  %1400 = vmatpush.bf16.msra.mxu3 %v3063_v11 }
  0xff   :  { %v3030_v18 = vld [vmem:[#allocation2 + $0x28] sm:$0xff]  ;;  %494 = vst.msk [vmem:[#allocation2 + $0x30] sm:$0xf] %vm480_vm3, %v476_v14  ;;  %v428_v20 = vadd.f32 %v407_v15, %v315_v13  ;;  %2483 = vmatmul.msk.bf16.gmra.mxu0 %vm628_vm4, %v3216_v16  ;;  %v316_v23 = vpop.f32.mrf.mxu1  ;;  %v3057_v16 = vld [vmem:[#allocation3 + $0x90] sm:$0xff] }
 0x100   :  { %2561 = vmatmul.msk.bf16.gmra.mxu1 %vm628_vm4, %v3030_v18  ;;  %v317_v32 = vadd.f32 %v316_v23, %v208_v21  ;;  %v3062_v18 = vld [vmem:[#allocation3 + $0xbc] sm:$0xff]  ;;  %v3056_v21 = vld [vmem:[#allocation3 + $0x88] sm:$0xff] }
 0x101   :  { %v447_v24 = vadd.f32 %v3576_v17, %v428_v20  ;;  %1317 = vmatpush.bf16.msra.mxu2 %v3058_v10  ;;  %v849_v23 = vld [vmem:[#allocation2 + $0x40] sm:$0xf]  ;;  %v3078_v9 = vld [vmem:[#allocation3 + $0x144] sm:$0xff] }
 0x102   :  { %1401 = vmatpush.bf16.msra.mxu3 %v3062_v18  ;;  %1882 = vmatpush.bf16.msra.mxu1 %v3109_v29  ;;  %v3072_v18 = vld [vmem:[#allocation3 + $0x110] sm:$0xff] }
 0x103   :  { %v462_v27 = vmax.f32 %v447_v24, 0.0  ;;  %v895_v24 = vunpack.c.l.b16 %v849_v23 }
 0x105   :  { %v477_v31 = vpack.c.bf16 %v462_v27, %v462_v27  ;;  %1318 = vmatpush.bf16.msra.mxu2 %v3057_v16  ;;  %v903_v27 = vpack.c.b16 %v895_v24, %v895_v24  ;;  %v3099_v16 = vld [vmem:[#allocation3 + $0x1f8] sm:$0xff]  ;;  %v3098_v24 = vld [vmem:[#allocation3 + $0x1f0] sm:$0xff] }
 0x106   :  { %v409_v34 = vpop.f32.mrf.mxu2  ;;  %v3301_v35 = vld [vmem:[#allocation2 + $0x2c] sm:$0xff]   ;;  %v211_v38 = vpop.f32.mrf.mxu0  ;;  %1402 = vmatpush.bf16.msra.mxu3 %v3061_v22 }
 0x107   :  { %495 = vst.msk [vmem:[#allocation2 + $0x34] sm:$0xf] %vm480_vm3, %v477_v31  ;;  %v429_v37 = vadd.f32 %v409_v34, %v317_v32  ;;  %2447 = vmatmul.msk.bf16.gmra.mxu3 %vm628_vm4, %v3301_v35  ;;  %v319_v39 = vpop.f32.mrf.mxu1  ;;  %v1505_v34 = vld [vmem:[#allocation3 + $0x164] sm:$0xf] }
 0x108   :  { %v320_v44 = vadd.f32 %v319_v39, %v211_v38  ;;  %v3641_v38 = vld [vmem:[%s3698_s4] ss:$0 sm:$0xff]  ;;  %v1535_v39 = vunpack.c.l.b16 %v1505_v34 }
 0x109   :  { %v448_v41 = vadd.f32 %v3576_v17, %v429_v37  ;;  %1319 = vmatpush.bf16.msra.mxu2 %v3056_v21 }
 0x10a   :  { %v1543_v45 = vpack.c.b16 %v1535_v39, %v1535_v39  ;;  %v3075_v39 = vld [vmem:[#allocation3 + $0x12c] sm:$0xff] }
 0x10b   :  { %v463_v43 = vmax.f32 %v448_v41, 0.0  ;;  %v3108_v41 = vld [vmem:[#allocation3 + $0x244] sm:$0xff] }
 0x10c   :  { %1883 = vmatpush.bf16.msra.mxu1 %v3108_v41  ;;  %v1555_v52 = vsel %vm653_vm2, %v1543_v45, 0 }
 0x10d   :  { %v478_v48 = vpack.c.bf16 %v463_v43, %v463_v43  ;;  %1320 = vmatpush.bf16.msra.mxu2 %v3055_v25 }
 0x10e   :  { %v412_v49 = vpop.f32.mrf.mxu2  ;;  %v3217_v50 = vld [vmem:[#allocation2 + $0x30] sm:$0xff]   ;;  %v213_v55 = vpop.f32.mrf.mxu0 }
 0x10f   :  { %v3031_v51 = vld [vmem:[#allocation2 + $0x30] sm:$0xff]  ;;  %496 = vst.msk [vmem:[#allocation2 + $0x38] sm:$0xf] %vm480_vm3, %v478_v48  ;;  %v430_v54 = vadd.f32 %v412_v49, %v320_v44  ;;  %2484 = vmatmul.msk.bf16.gmra.mxu0 %vm628_vm4, %v3217_v50  ;;  %v321_v57 = vpop.f32.mrf.mxu1  ;;  %v3204_v14 = vunpack.c.h.b16 %v3217_v50 }
 0x110   :  { %2562 = vmatmul.msk.bf16.gmra.mxu1 %vm628_vm4, %v3031_v51 }
 0x111   :  { %v449_v59 = vadd.f32 %v3576_v17, %v430_v54  ;;  %v1798_v17 = vsel %vm653_vm2, %v1786_v7, 0  ;;  %1321 = vmatpush.bf16.msra.mxu2 %v3054_v30  ;;  %1884 = vmatpush.bf16.msra.mxu1 %v3107_v3  ;;  %v3093_v3 = vld [vmem:[#allocation3 + $0x1c4] sm:$0xff] }
 0x112   :  { %1800 = vmatpush.bf16.msra.mxu0 %v1798_v17  ;;  %v3073_v17 = vld [vmem:[#allocation3 + $0x118] sm:$0xff] }
 0x113   :  { %v464_v60 = vmax.f32 %v449_v59, 0.0 }
 0x115   :  { %v479_v0 = vpack.c.bf16 %v464_v60, %v464_v60 }
 0x116   :  { %v414_v4 = vpop.f32.mrf.mxu2  ;;  %1801 = vmatpush.bf16.msra.mxu0 %v3102_v28 }
 0x117   :  { %497 = vst.msk [vmem:[#allocation2 + $0x3c] sm:$0xf] %vm480_vm3, %v479_v0 }
 0x11a   :  { %1802 = vmatpush.bf16.msra.mxu0 %v3101_v40 }
 0x11e   :  { %v512_v12 = vld [vmem:[#allocation2 + $0x38] sm:$0xff]   ;;  %1803 = vmatpush.bf16.msra.mxu0 %v3100_v2 }
 0x11f   :  { %v3032_v13 = vld [vmem:[#allocation2 + $0x38] sm:$0xff]  ;;  %v573_v15 = vunpack.c.l.b16 %v512_v12  ;;  %v574_v31 = vunpack.c.h.b16 %v512_v12 }
 0x120   :  { %2563 = vmatmul.msk.bf16.gmra.mxu1 %vm628_vm4, %v3032_v13  ;;  %v3088_v2 = vld [vmem:[#allocation3 + $0x198] sm:$0xff] }
 0x121   :  { %v581_v19 = vpack.c.b16 %v573_v15, %v3204_v14  ;;  %v714_v20 = vpack.c.b16 %v573_v15, %v573_v15  ;;  %v582_v32 = vpack.c.b16 %v574_v31, %v574_v31  ;;  %v1667_v15 = vld [vmem:[#allocation3 + $0x1dc] sm:$0xf] }
 0x122   :  { %1804 = vmatpush.bf16.msra.mxu0 %v3099_v16  ;;  %v1697_v22 = vunpack.c.l.b16 %v1667_v15  ;;  %v3091_v15 = vld [vmem:[#allocation3 + $0x1b4] sm:$0xff]  ;;  %v3130_v16 = vld [vmem:[#allocation3 + $0x300] sm:$0xff] }
 0x123   :  { %2448 = vmatmul.msk.bf16.gmra.mxu3 %vm628_vm4, %v581_v19  ;;  %2485 = vmatmul.msk.bf16.gmra.mxu0 %vm628_vm4, %v714_v20  ;;  %v3077_v19 = vld [vmem:[#allocation3 + $0x13c] sm:$0xff] }
 0x124   :  { %v1705_v34 = vpack.c.b16 %v1697_v22, %v1697_v22 }
 0x126   :  { %1805 = vmatpush.bf16.msra.mxu0 %v3098_v24  ;;  %v1717_v41 = vsel %vm653_vm2, %v1705_v34, 0  ;;  %v1910_v34 = vld [vmem:[#allocation3 + $0x290] sm:$0xf] }
 0x12c   :  { %v796_v26 = vpop.f32.mrf.mxu0 }
 0x130   :  { %2564 = vmatmul.msk.bf16.gmra.mxu1 %vm628_vm4, %v903_v27  ;;  %v3076_v27 = vld [vmem:[#allocation3 + $0x134] sm:$0xff] }
 0x133   :  { %2449 = vmatmul.msk.bf16.gmra.mxu3 %vm628_vm4, %v582_v32  ;;  %v3106_v32 = vld [vmem:[#allocation3 + $0x234] sm:$0xff] }
 0x134   :  { %v798_v33 = vpop.f32.mrf.mxu0  ;;  %1885 = vmatpush.bf16.msra.mxu1 %v3106_v32 }
 0x13a   :  { %v666_v35 = vpop.f32.mrf.mxu3 }
 0x13b   :  { %v797_v36 = vadd.f32 %v796_v26, %v666_v35  ;;  %v3071_v26 = vld [vmem:[#allocation3 + $0x108] sm:$0xff]  ;;  %v1586_v35 = vld [vmem:[#allocation3 + $0x1a0] sm:$0xf] }
 0x13c   :  { %v801_v37 = vpop.f32.mrf.mxu0 }
 0x13d   :  { %v985_v42 = vpop.f32.mrf.mxu1 }
 0x13e   :  { %v1024_v43 = vadd.f32 %v985_v42, %v797_v36  ;;  %v3097_v36 = vld [vmem:[#allocation3 + $0x1e8] sm:$0xff]  ;;  %v1616_v42 = vunpack.c.l.b16 %v1586_v35 }
 0x13f   :  { %1806 = vmatpush.bf16.msra.mxu0 %v3097_v36 }
 0x140   :  { %v1043_v44 = vadd.f32 %v3641_v38, %v1024_v43  ;;  %v3096_v43 = vld [vmem:[#allocation3 + $0x1e0] sm:$0xff] }
 0x142   :  { %v1058_v47 = vmax.f32 %v1043_v44, 0.0  ;;  %v668_v48 = vpop.f32.mrf.mxu3  ;;  %v3105_v44 = vld [vmem:[#allocation3 + $0x22c] sm:$0xff] }
 0x143   :  { %v799_v50 = vadd.f32 %v798_v33, %v668_v48  ;;  %1807 = vmatpush.bf16.msra.mxu0 %v3096_v43  ;;  %1886 = vmatpush.bf16.msra.mxu1 %v3105_v44 }
 0x144   :  { %v1073_v49 = vpack.c.bf16 %v1058_v47, %v1058_v47  ;;  %v803_v51 = vpop.f32.mrf.mxu0 }
 0x145   :  { %v987_v54 = vpop.f32.mrf.mxu1 }
 0x146   :  { %v1025_v55 = vadd.f32 %v987_v54, %v799_v50  ;;  %2622 = vmatmul.msk.bf16.vlgmr.msrb.gmra.mxu3 %vm628_vm4, %v1073_v49  ;;  %v3095_v50 = vld [vmem:[#allocation3 + $0x1d4] sm:$0xff]  ;;  %v3104_v54 = vld [vmem:[#allocation3 + $0x224] sm:$0xff] }
 0x147   :  { %1557 = vmatpush.bf16.msrb.mxu3 %v1555_v52  ;;  %v1624_v52 = vpack.c.b16 %v1616_v42, %v1616_v42  ;;  %1887 = vmatpush.bf16.msra.mxu1 %v3104_v54 }
 0x148   :  { %v1044_v57 = vadd.f32 %v3641_v38, %v1025_v55  ;;  %v3068_v55 = vld [vmem:[#allocation3 + $0xf0] sm:$0xff] }
 0x14a   :  { %v1059_v59 = vmax.f32 %v1044_v57, 0.0  ;;  %v671_v60 = vpop.f32.mrf.mxu3 }
 0x14b   :  { %1558 = vmatpush.bf16.msrb.mxu3 %v3081_v56  ;;  %v802_v63 = vadd.f32 %v801_v37, %v671_v60  ;;  %v3070_v37 = vld [vmem:[#allocation3 + $0x100] sm:$0xff] }
 0x14c   :  { %v1074_v62 = vpack.c.bf16 %v1059_v59, %v1059_v59  ;;  %v806_v0 = vpop.f32.mrf.mxu0  ;;  %v1636_v59 = vsel %vm653_vm2, %v1624_v52, 0  ;;  %v3123_v52 = vld [vmem:[#allocation3 + $0x2c4] sm:$0xff] }
 0x14d   :  { %v990_v4 = vpop.f32.mrf.mxu1 }
 0x14e   :  { %2593 = vmatmul.msk.bf16.vlgmr.msrb.gmra.mxu2 %vm628_vm4, %v1074_v62  ;;  %v1026_v7 = vadd.f32 %v990_v4, %v802_v63  ;;  %v2072_v4 = vld [vmem:[#allocation3 + $0x308] sm:$0xf] }
 0x14f   :  { %1476 = vmatpush.bf16.msrb.mxu2 %v1474_v1  ;;  %1559 = vmatpush.bf16.msrb.mxu3 %v3080_v61  ;;  %v3103_v61 = vld [vmem:[#allocation3 + $0x21c] sm:$0xff] }
 0x150   :  { %v1045_v10 = vadd.f32 %v3641_v38, %v1026_v7  ;;  %1888 = vmatpush.bf16.msra.mxu1 %v3103_v61 }
 0x152   :  { %v673_v8 = vpop.f32.mrf.mxu3  ;;  %v1060_v20 = vmax.f32 %v1045_v10, 0.0 }
 0x153   :  { %1477 = vmatpush.bf16.msrb.mxu2 %v3074_v5  ;;  %1560 = vmatpush.bf16.msrb.mxu3 %v3079_v6  ;;  %v804_v11 = vadd.f32 %v803_v51, %v673_v8  ;;  %v2102_v6 = vunpack.c.l.b16 %v2072_v4  ;;  %v3087_v8 = vld [vmem:[#allocation3 + $0x190] sm:$0xff]  ;;  %v3116_v4 = vld [vmem:[#allocation3 + $0x288] sm:$0xff] }
 0x154   :  { %v808_v12 = vpop.f32.mrf.mxu0  ;;  %v1075_v28 = vpack.c.bf16 %v1060_v20, %v1060_v20 }
 0x155   :  { %v992_v13 = vpop.f32.mrf.mxu1  ;;  %v2110_v7 = vpack.c.b16 %v2102_v6, %v2102_v6  ;;  %v3121_v6 = vld [vmem:[#allocation3 + $0x2b4] sm:$0xff] }
 0x156   :  { %v1027_v14 = vadd.f32 %v992_v13, %v804_v11  ;;  %v3086_v11 = vld [vmem:[#allocation3 + $0x188] sm:$0xff] }
 0x157   :  { %1478 = vmatpush.bf16.msrb.mxu2 %v3073_v17  ;;  %1561 = vmatpush.bf16.msrb.mxu3 %v3078_v9  ;;  %v3092_v17 = vld [vmem:[#allocation3 + $0x1bc] sm:$0xff]  ;;  %v2122_v9 = vsel %vm653_vm2, %v2110_v7, 0 }
 0x158   :  { %v1046_v21 = vadd.f32 %v3641_v38, %v1027_v14  ;;  %2124 = vmatpush.bf16.msrb.mxu0 %v2122_v9  ;;  %v3125_v7 = vld [vmem:[#allocation3 + $0x2d8] sm:$0xff] }
 0x15a   :  { %v1061_v23 = vmax.f32 %v1046_v21, 0.0  ;;  %v676_v25 = vpop.f32.mrf.mxu3 }
 0x15b   :  { %1479 = vmatpush.bf16.msrb.mxu2 %v3072_v18  ;;  %1562 = vmatpush.bf16.msrb.mxu3 %v3077_v19  ;;  %v807_v30 = vadd.f32 %v806_v0, %v676_v25  ;;  %v2153_v18 = vld [vmem:[#allocation3 + $0x344] sm:$0xf] }
 0x15c   :  { %v1076_v29 = vpack.c.bf16 %v1061_v23, %v1061_v23  ;;  %v3651_v31 = vpop.f32.mrf.mxu0  ;;  %v2183_v20 = vunpack.c.l.b16 %v2153_v18  ;;  %2125 = vmatpush.bf16.msrb.mxu0 %v3130_v16  ;;  %v3129_v23 = vld [vmem:[#allocation3 + $0x2f8] sm:$0xff]  ;;  %v3085_v25 = vld [vmem:[#allocation3 + $0x180] sm:$0xff] }
 0x15d   :  { %v995_v33 = vpop.f32.mrf.mxu1  ;;  %v3114_v18 = vld [vmem:[#allocation3 + $0x278] sm:$0xff] }
 0x15e   :  { %2651 = vmatmul.msk.bf16.vlgmr.msra.gmra.mxu2 %vm628_vm4, %v1075_v28  ;;  %2680 = vmatmul.msk.bf16.vlgmr.msra.gmra.mxu3 %vm628_vm4, %v1076_v29  ;;  %v1028_v40 = vadd.f32 %v995_v33, %v807_v30  ;;  %v2191_v24 = vpack.c.b16 %v2183_v20, %v2183_v20  ;;  %v3084_v33 = vld [vmem:[#allocation3 + $0x178] sm:$0xff] }
 0x15f   :  { %1480 = vmatpush.bf16.msrb.mxu2 %v3071_v26  ;;  %1563 = vmatpush.bf16.msrb.mxu3 %v3076_v27  ;;  %v3090_v26 = vld [vmem:[#allocation3 + $0x1ac] sm:$0xff]  ;;  %v3132_v20 = vld [vmem:[#allocation3 + $0x314] sm:$0xff] }
 0x160   :  { %v1047_v47 = vadd.f32 %v3641_v38, %v1028_v40  ;;  %v2203_v29 = vsel %vm653_vm2, %v2191_v24, 0  ;;  %2126 = vmatpush.bf16.msrb.mxu0 %v3129_v23  ;;  %v3137_v40 = vld [vmem:[#allocation3 + $0x33c] sm:$0xff]  ;;  %v3113_v24 = vld [vmem:[#allocation3 + $0x270] sm:$0xff] }
 0x161   :  { %2205 = vmatpush.bf16.msrb.mxu1 %v2203_v29 }
 0x162   :  { %v678_v45 = vpop.f32.mrf.mxu3  ;;  %v1062_v56 = vmax.f32 %v1047_v47, 0.0  ;;  %v3136_v47 = vld [vmem:[#allocation3 + $0x334] sm:$0xff] }
 0x163   :  { %1481 = vmatpush.bf16.msrb.mxu2 %v3070_v37  ;;  %1564 = vmatpush.bf16.msrb.mxu3 %v3075_v39  ;;  %v809_v48 = vadd.f32 %v808_v12, %v678_v45  ;;  %v1991_v12 = vld [vmem:[#allocation3 + $0x2cc] sm:$0xf]  ;;  %v3089_v37 = vld [vmem:[#allocation3 + $0x1a4] sm:$0xff]  ;;  %v3128_v39 = vld [vmem:[#allocation3 + $0x2f0] sm:$0xff]  ;;  %v1940_v45 = vunpack.c.l.b16 %v1910_v34 }
 0x164   :  { %v813_v49 = vpop.f32.mrf.mxu0  ;;  %v1077_v63 = vpack.c.bf16 %v1062_v56, %v1062_v56  ;;  %v2021_v22 = vunpack.c.l.b16 %v1991_v12  ;;  %2127 = vmatpush.bf16.msrb.mxu0 %v3128_v39  ;;  %v3117_v34 = vld [vmem:[#allocation3 + $0x294] sm:$0xff] }
 0x165   :  { %v997_v51 = vpop.f32.mrf.mxu1  ;;  %2206 = vmatpush.bf16.msrb.mxu1 %v3137_v40  ;;  %v1948_v54 = vpack.c.b16 %v1940_v45, %v1940_v45 }
 0x166   :  { %v1029_v53 = vadd.f32 %v997_v51, %v809_v48  ;;  %v2029_v30 = vpack.c.b16 %v2021_v22, %v2021_v22 }
 0x167   :  { %1719 = vmatpush.bf16.msra.mxu3 %v1717_v41  ;;  %1482 = vmatpush.bf16.msrb.mxu2 %v3069_v46  ;;  %v3127_v46 = vld [vmem:[#allocation3 + $0x2e8] sm:$0xff] }
 0x168   :  { %v1048_v57 = vadd.f32 %v3641_v38, %v1029_v53  ;;  %v2041_v44 = vsel %vm653_vm2, %v2029_v30, 0  ;;  %2128 = vmatpush.bf16.msrb.mxu0 %v3127_v46 }
 0x169   :  { %2207 = vmatpush.bf16.msrb.mxu1 %v3136_v47 }
 0x16a   :  { %v1063_v60 = vmax.f32 %v1048_v57, 0.0  ;;  %v681_v62 = vpop.f32.mrf.mxu3 }
 0x16b   :  { %1720 = vmatpush.bf16.msra.mxu3 %v3095_v50  ;;  %1483 = vmatpush.bf16.msrb.mxu2 %v3068_v55  ;;  %v812_v27 = vadd.f32 %v3651_v31, %v681_v62  ;;  %v3122_v62 = vld [vmem:[#allocation3 + $0x2bc] sm:$0xff] }
 0x16c   :  { %v1078_v0 = vpack.c.bf16 %v1063_v60, %v1063_v60  ;;  %v816_v1 = vpop.f32.mrf.mxu0 }
 0x16d   :  { %v1000_v5 = vpop.f32.mrf.mxu1 }
 0x16e   :  { %2709 = vmatmul.msk.bf16.vlgmr.msrb.gmra.mxu2 %vm628_vm4, %v1077_v63  ;;  %2738 = vmatmul.msk.bf16.vlgmr.msrb.gmra.mxu3 %vm628_vm4, %v1078_v0  ;;  %v1030_v41 = vadd.f32 %v1000_v5, %v812_v27  ;;  %v3126_v63 = vld [vmem:[#allocation3 + $0x2e0] sm:$0xff]  ;;  %v3135_v0 = vld [vmem:[#allocation3 + $0x32c] sm:$0xff] }
 0x16f   :  { %1638 = vmatpush.bf16.msra.mxu2 %v1636_v59  ;;  %1721 = vmatpush.bf16.msra.mxu3 %v3094_v58  ;;  %v3082_v59 = vld [vmem:[#allocation3 + $0x168] sm:$0xff] }
 0x170   :  { %v1049_v50 = vadd.f32 %v3641_v38, %v1030_v41  ;;  %2129 = vmatpush.bf16.msrb.mxu0 %v3126_v63  ;;  %2208 = vmatpush.bf16.msrb.mxu1 %v3135_v0  ;;  %v3141_v63 = vld [vmem:[#allocation3 + $0x360] sm:$0xff] }
 0x172   :  { %v683_v10 = vpop.f32.mrf.mxu3  ;;  %v1064_v60 = vmax.f32 %v1049_v50, 0.0  ;;  %v3144_v50 = vld [vmem:[#allocation3 + $0x378] sm:$0xff] }
 0x173   :  { %1639 = vmatpush.bf16.msra.mxu2 %v3088_v2  ;;  %1722 = vmatpush.bf16.msra.mxu3 %v3093_v3  ;;  %v814_v13 = vadd.f32 %v813_v49, %v683_v10  ;;  %v3083_v49 = vld [vmem:[#allocation3 + $0x170] sm:$0xff]  ;;  %v1960_v2 = vsel %vm653_vm2, %v1948_v54, 0 }
 0x174   :  { %v818_v14 = vpop.f32.mrf.mxu0  ;;  %v1079_v5 = vpack.c.bf16 %v1064_v60, %v1064_v60  ;;  %2130 = vmatpush.bf16.msrb.mxu0 %v3125_v7  ;;  %v3143_v54 = vld [vmem:[#allocation3 + $0x370] sm:$0xff] }
 0x175   :  { %v1002_v19 = vpop.f32.mrf.mxu1 }
 0x176   :  { %v1031_v21 = vadd.f32 %v1002_v19, %v814_v13  ;;  %v3120_v13 = vld [vmem:[#allocation3 + $0x2ac] sm:$0xff]  ;;  %v3119_v19 = vld [vmem:[#allocation3 + $0x2a4] sm:$0xff] }
 0x177   :  { %1640 = vmatpush.bf16.msra.mxu2 %v3087_v8  ;;  %1723 = vmatpush.bf16.msra.mxu3 %v3092_v17  ;;  %v3134_v8 = vld [vmem:[#allocation3 + $0x324] sm:$0xff] }
 0x178   :  { %v1050_v28 = vadd.f32 %v3641_v38, %v1031_v21  ;;  %2209 = vmatpush.bf16.msrb.mxu1 %v3134_v8  ;;  %v3139_v8 = vld [vmem:[#allocation3 + $0x350] sm:$0xff] }
 0x17a   :  { %v686_v32 = vpop.f32.mrf.mxu3  ;;  %v1065_v31 = vmax.f32 %v1050_v28, 0.0 }
 0x17b   :  { %1641 = vmatpush.bf16.msra.mxu2 %v3086_v11  ;;  %1724 = vmatpush.bf16.msra.mxu3 %v3091_v15  ;;  %v817_v35 = vadd.f32 %v816_v1, %v686_v32  ;;  %v3115_v11 = vld [vmem:[#allocation3 + $0x280] sm:$0xff] }
 0x17c   :  { %v3665_v36 = vpop.f32.mrf.mxu0  ;;  %v1080_v51 = vpack.c.bf16 %v1065_v31, %v1065_v31  ;;  %v3133_v15 = vld [vmem:[#allocation3 + $0x31c] sm:$0xff] }
 0x17d   :  { %v1005_v42 = vpop.f32.mrf.mxu1  ;;  %2210 = vmatpush.bf16.msrb.mxu1 %v3133_v15  ;;  %v2234_v32 = vld [vmem:[#allocation3 + $0x380] sm:$0xf] }
 0x17e   :  { %v1032_v43 = vadd.f32 %v1005_v42, %v817_v35  ;;  %v2264_v39 = vunpack.c.l.b16 %v2234_v32  ;;  %v3111_v31 = vld [vmem:[#allocation3 + $0x260] sm:$0xff] }
 0x17f   :  { %1642 = vmatpush.bf16.msra.mxu2 %v3085_v25  ;;  %1725 = vmatpush.bf16.msra.mxu3 %v3090_v26  ;;  %v3118_v25 = vld [vmem:[#allocation3 + $0x29c] sm:$0xff]  ;;  %v3131_v26 = vld [vmem:[#allocation3 + $0x30c] sm:$0xff] }
 0x180   :  { %v1051_v48 = vadd.f32 %v3641_v38, %v1032_v43  ;;  %v2272_v42 = vpack.c.b16 %v2264_v39, %v2264_v39 }
 0x181   :  { %2211 = vmatpush.bf16.msrb.mxu1 %v3132_v20 }
 0x182   :  { %v1066_v53 = vmax.f32 %v1051_v48, 0.0  ;;  %v688_v55 = vpop.f32.mrf.mxu3  ;;  %v2284_v46 = vsel %vm653_vm2, %v2272_v42, 0 }
 0x183   :  { %1643 = vmatpush.bf16.msra.mxu2 %v3084_v33  ;;  %1726 = vmatpush.bf16.msra.mxu3 %v3089_v37  ;;  %v819_v57 = vadd.f32 %v818_v14, %v688_v55  ;;  %v3124_v14 = vld [vmem:[#allocation3 + $0x2d0] sm:$0xff]  ;;  %v3112_v33 = vld [vmem:[#allocation3 + $0x268] sm:$0xff] }
 0x184   :  { %v1081_v56 = vpack.c.bf16 %v1066_v53, %v1066_v53  ;;  %v823_v58 = vpop.f32.mrf.mxu0  ;;  %2131 = vmatpush.bf16.msrb.mxu0 %v3124_v14 }
 0x185   :  { %v1007_v61 = vpop.f32.mrf.mxu1  ;;  %2212 = vmatpush.bf16.msrb.mxu1 %v3131_v26 }
 0x186   :  { %2796 = vmatmul.msk.bf16.vlgmr.msra.gmra.mxu3 %vm628_vm4, %v1080_v51  ;;  %v1033_v1 = vadd.f32 %v1007_v61, %v819_v57  ;;  %2825 = vmatmul.msk.bf16.vlgmr.msra.gmra.mxu0 %vm628_vm4, %v1081_v56 }
 0x187   :  { %2043 = vmatpush.bf16.msrb.mxu3 %v2041_v44  ;;  %1644 = vmatpush.bf16.msra.mxu2 %v3083_v49  ;;  %v3110_v44 = vld [vmem:[#allocation3 + $0x258] sm:$0xff] }
 0x188   :  { %v1052_v3 = vadd.f32 %v3641_v38, %v1033_v1 }
 0x18a   :  { %v1067_v17 = vmax.f32 %v1052_v3, 0.0  ;;  %v691_v9 = vpop.f32.mrf.mxu3 }
 0x18b   :  { %2044 = vmatpush.bf16.msrb.mxu3 %v3123_v52  ;;  %1645 = vmatpush.bf16.msra.mxu2 %v3082_v59  ;;  %v822_v27 = vadd.f32 %v3665_v36, %v691_v9  ;;  %v3142_v59 = vld [vmem:[#allocation3 + $0x368] sm:$0xff] }
 0x18c   :  { %v1082_v10 = vpack.c.bf16 %v1067_v17, %v1067_v17  ;;  %v826_v16 = vpop.f32.mrf.mxu0 }
 0x18d   :  { %v1010_v12 = vpop.f32.mrf.mxu1 }
 0x18e   :  { %2767 = vmatmul.msk.bf16.vlgmr.msra.gmra.mxu2 %vm628_vm4, %v1079_v5  ;;  %2854 = vmatmul.msk.bf16.vlgmr.msra.gmra.mxu1 %vm628_vm4, %v1082_v10  ;;  %v1034_v35 = vadd.f32 %v1010_v12, %v822_v27  ;;  %v3138_v10 = vld [vmem:[#allocation3 + $0x348] sm:$0xff] }
 0x18f   :  { %1962 = vmatpush.bf16.msrb.mxu2 %v1960_v2  ;;  %2045 = vmatpush.bf16.msrb.mxu3 %v3122_v62 }
 0x190   :  { %v1053_v36 = vadd.f32 %v3641_v38, %v1034_v35 }
 0x192   :  { %v693_v21 = vpop.f32.mrf.mxu3  ;;  %v1068_v45 = vmax.f32 %v1053_v36, 0.0 }
 0x193   :  { %1963 = vmatpush.bf16.msrb.mxu2 %v3116_v4  ;;  %2046 = vmatpush.bf16.msrb.mxu3 %v3121_v6  ;;  %v824_v22 = vadd.f32 %v823_v58, %v693_v21  ;;  %v3140_v4 = vld [vmem:[#allocation3 + $0x358] sm:$0xff] }
 0x194   :  { %v828_v29 = vpop.f32.mrf.mxu0  ;;  %v1083_v48 = vpack.c.bf16 %v1068_v45, %v1068_v45 }
 0x195   :  { %v1012_v23 = vpop.f32.mrf.mxu1 }
 0x196   :  { %v1035_v28 = vadd.f32 %v1012_v23, %v824_v22 }
 0x197   :  { %1964 = vmatpush.bf16.msrb.mxu2 %v3115_v11  ;;  %2047 = vmatpush.bf16.msrb.mxu3 %v3120_v13 }
 0x198   :  { %v1054_v30 = vadd.f32 %v3641_v38, %v1035_v28 }
 0x19a   :  { %v1069_v37 = vmax.f32 %v1054_v30, 0.0 }
 0x19b   :  { %1965 = vmatpush.bf16.msrb.mxu2 %v3114_v18  ;;  %2048 = vmatpush.bf16.msrb.mxu3 %v3119_v19 }
 0x19c   :  { %v1084_v40 = vpack.c.bf16 %v1069_v37, %v1069_v37 }
 0x19d   :  { %v1015_v41 = vpop.f32.mrf.mxu1 }
 0x19f   :  { %1966 = vmatpush.bf16.msrb.mxu2 %v3113_v24  ;;  %2049 = vmatpush.bf16.msrb.mxu3 %v3118_v25 }
 0x1a0   :  { %v831_v43 = vpop.f32.mrf.mxu0 }
 0x1a3   :  { %1967 = vmatpush.bf16.msrb.mxu2 %v3112_v33  ;;  %2050 = vmatpush.bf16.msrb.mxu3 %v3117_v34 }
 0x1a5   :  { %v1017_v47 = vpop.f32.mrf.mxu1 }
 0x1a6   :  { %2912 = vmatmul.msk.bf16.vlgmr.msrb.gmra.mxu3 %vm628_vm4, %v1084_v40  ;;  %v696_v49 = vpop.f32.mrf.mxu3 }
 0x1a7   :  { %1968 = vmatpush.bf16.msrb.mxu2 %v3111_v31  ;;  %v827_v51 = vadd.f32 %v826_v16, %v696_v49 }
 0x1a8   :  { %v833_v52 = vpop.f32.mrf.mxu0 }
 0x1a9   :  { %v1036_v53 = vadd.f32 %v1015_v41, %v827_v51 }
 0x1ab   :  { %1969 = vmatpush.bf16.msrb.mxu2 %v3110_v44  ;;  %v1055_v55 = vadd.f32 %v3641_v38, %v1036_v53 }
 0x1ad   :  { %v1070_v56 = vmax.f32 %v1055_v55, 0.0  ;;  %v1020_v57 = vpop.f32.mrf.mxu1  ;;  %v3308_v55 = vld [vmem:[%s3700_s6] ss:$0 sm:$0xff] }
 0x1ae   :  { %2883 = vmatmul.msk.bf16.vlgmr.msrb.gmra.mxu2 %vm628_vm4, %v1083_v48  ;;  %v698_v58 = vpop.f32.mrf.mxu3 }
 0x1af   :  { %2286 = vmatpush.bf16.msra.mxu2 %v2284_v46  ;;  %v1085_v60 = vpack.c.bf16 %v1070_v56, %v1070_v56  ;;  %v829_v61 = vadd.f32 %v828_v29, %v698_v58 }
 0x1b1   :  { %v1037_v62 = vadd.f32 %v1017_v47, %v829_v61  ;;  %2941 = vmatmul.msk.bf16.vlgmr.msrb.gmra.mxu0 %vm628_vm4, %v1085_v60 }
 0x1b3   :  { %2287 = vmatpush.bf16.msra.mxu2 %v3144_v50  ;;  %v1056_v0 = vadd.f32 %v3641_v38, %v1037_v62 }
 0x1b5   :  { %v1071_v1 = vmax.f32 %v1056_v0, 0.0  ;;  %v1022_v2 = vpop.f32.mrf.mxu1 }
 0x1b6   :  { %v701_v3 = vpop.f32.mrf.mxu3 }
 0x1b7   :  { %2288 = vmatpush.bf16.msra.mxu2 %v3143_v54  ;;  %v1086_v5 = vpack.c.bf16 %v1071_v1, %v1071_v1  ;;  %v832_v6 = vadd.f32 %v831_v43, %v701_v3 }
 0x1b9   :  { %v1038_v7 = vadd.f32 %v1020_v57, %v832_v6  ;;  %2970 = vmatmul.msk.bf16.vlgmr.msrb.gmra.mxu1 %vm628_vm4, %v1086_v5 }
 0x1bb   :  { %2289 = vmatpush.bf16.msra.mxu2 %v3142_v59  ;;  %v1057_v17 = vadd.f32 %v3641_v38, %v1038_v7 }
 0x1bd   :  { %v1072_v11 = vmax.f32 %v1057_v17, 0.0 }
 0x1be   :  { %v703_v9 = vpop.f32.mrf.mxu3 }
 0x1bf   :  { %2290 = vmatpush.bf16.msra.mxu2 %v3141_v63  ;;  %v1087_v12 = vpack.c.bf16 %v1072_v11, %v1072_v11 }
 0x1c3   :  { %2291 = vmatpush.bf16.msra.mxu2 %v3140_v4 }
 0x1c7   :  { %2292 = vmatpush.bf16.msra.mxu2 %v3139_v8 }
 0x1c9   :  { %v1243_v13 = vpop.f32.mrf.mxu3 }
 0x1cb   :  { %2293 = vmatpush.bf16.msra.mxu2 %v3138_v10 }
 0x1ce   :  { %2999 = vmatmul.msk.bf16.vlgmr.msra.gmra.mxu2 %vm628_vm4, %v1087_v12 }
 0x1d1   :  { %v1179_v14 = vpop.f32.mrf.mxu2  ;;  %v1245_v15 = vpop.f32.mrf.mxu3 }
 0x1d2   :  { %v1244_v16 = vadd.f32 %v1243_v13, %v1179_v14 }
 0x1d9   :  { %v1181_v18 = vpop.f32.mrf.mxu2 }
 0x1e1   :  { %v1323_v19 = vpop.f32.mrf.mxu2  ;;  %v1404_v20 = vpop.f32.mrf.mxu3 }
 0x1e2   :  { %v1327_v21 = vadd.f32 %v1323_v19, %v1244_v16 }
 0x1e4   :  { %v1408_v22 = vadd.f32 %v1404_v20, %v1327_v21 }
 0x1e9   :  { %v1325_v23 = vpop.f32.mrf.mxu2  ;;  %v1406_v24 = vpop.f32.mrf.mxu3 }
 0x1f1   :  { %v1485_v38 = vpop.f32.mrf.mxu2  ;;  %v1566_v25 = vpop.f32.mrf.mxu3 }
 0x1f2   :  { %v1489_v26 = vadd.f32 %v1485_v38, %v1408_v22 }
 0x1f4   :  { %v1570_v27 = vadd.f32 %v1566_v25, %v1489_v26 }
 0x1f9   :  { %v1487_v28 = vpop.f32.mrf.mxu2  ;;  %v1568_v29 = vpop.f32.mrf.mxu3 }
 0x203   :  { %v1809_v30 = vpop.f32.mrf.mxu0 }
 0x209   :  { %v1728_v32 = vpop.f32.mrf.mxu3 }
 0x20b   :  { %v1811_v33 = vpop.f32.mrf.mxu0  ;;  %v1890_v34 = vpop.f32.mrf.mxu1 }
 0x211   :  { %v1647_v35 = vpop.f32.mrf.mxu2  ;;  %v1730_v37 = vpop.f32.mrf.mxu3 }
 0x212   :  { %v1651_v43 = vadd.f32 %v1647_v35, %v1570_v27 }
 0x213   :  { %v1892_v39 = vpop.f32.mrf.mxu1 }
 0x214   :  { %v1732_v44 = vadd.f32 %v1728_v32, %v1651_v43 }
 0x216   :  { %v1813_v48 = vadd.f32 %v1809_v30, %v1732_v44 }
 0x218   :  { %v1894_v49 = vadd.f32 %v1890_v34, %v1813_v48 }
 0x219   :  { %v1649_v40 = vpop.f32.mrf.mxu2 }
 0x229   :  { %v2052_v41 = vpop.f32.mrf.mxu3 }
 0x22e   :  { %v2133_v42 = vpop.f32.mrf.mxu0 }
 0x231   :  { %v1971_v31 = vpop.f32.mrf.mxu2  ;;  %v2054_v36 = vpop.f32.mrf.mxu3 }
 0x232   :  { %v1975_v50 = vadd.f32 %v1971_v31, %v1894_v49 }
 0x234   :  { %v2056_v52 = vadd.f32 %v2052_v41, %v1975_v50 }
 0x236   :  { %v2135_v46 = vpop.f32.mrf.mxu0  ;;  %v2214_v47 = vpop.f32.mrf.mxu1  ;;  %v2137_v53 = vadd.f32 %v2133_v42, %v2056_v52 }
 0x238   :  { %v2218_v54 = vadd.f32 %v2214_v47, %v2137_v53 }
 0x239   :  { %v1973_v45 = vpop.f32.mrf.mxu2 }
 0x23e   :  { %v2216_v51 = vpop.f32.mrf.mxu1 }
 0x251   :  { %v2295_v56 = vpop.f32.mrf.mxu2 }
 0x252   :  { %v2299_v57 = vadd.f32 %v2295_v56, %v2218_v54 }
 0x254   :  { %v2304_v58 = vadd.f32 %v3308_v55, %v2299_v57 }
 0x256   :  { %2305 = vst [vmem:[%s3701_s7] sm:$0xff] %v2304_v58 }
 0x259   :  { %v2297_v59 = vpop.f32.mrf.mxu2 }
 0x25a   :  { %2310 = vsyncpa [#allocation4], 1 }

</bundles_post_ra>
